<compile_context>
chip_gen: v7x
topology: tpu7x:2x2x1
jax: 0.10.0
libtpu: 0.0.40
codegen_flags: <defaults>
</compile_context>

<pallas_src>
import jax
import jax.numpy as jnp
from jax.experimental import pallas as pl
from jax.experimental.pallas import tpu as pltpu

NUM_FEATURES = 10
HIDDEN = 20
NUM_CLASSES = 2
NUM_LAYERS = 3
BN_EPS = 1e-5
GIN_EPS = 0.0

LANE = 128                      # padded width of every feature/class dim
TM = 256                        # row/col tile of the block-sparse tiled path
FUSED_MAX_NODES = 2048          # fused path cap (A bf16 <= 8 MiB in VMEM)
VMEM_LIMIT = 48 * 1024 * 1024   # fits v7x's 64 MiB physical VMEM with headroom


# ---------------------------------------------------------------------------
# helpers
# ---------------------------------------------------------------------------
def _round_up(x, m):
    return (x + m - 1) // m * m


def _pad2d(x, rows, cols, dtype=jnp.bfloat16):
    out = jnp.zeros((rows, cols), dtype)
    return out.at[:x.shape[0], :x.shape[1]].set(x.astype(dtype))


def _pad1d(x, cols=LANE):
    return jnp.zeros((cols,), jnp.float32).at[:x.shape[0]].set(
        x.astype(jnp.float32))


def _pack_params(params):
    """Pack all layer weights/vectors into a few padded slabs (fewer DMAs)."""
    wslab = jnp.stack([_pad2d(w, LANE, LANE)
                       for p in params["layers"] for w in (p["w1"], p["w2"])])
    vslab = jnp.stack([
        jnp.zeros((8, LANE), jnp.float32)
        .at[0].set(_pad1d(p["b1"])).at[1].set(_pad1d(p["b2"]))
        .at[2].set(_pad1d(p["gamma"])).at[3].set(_pad1d(p["beta"]))
        for p in params["layers"]])
    wfc_pad = _pad2d(params["wfc"], LANE, LANE)
    vfc = jnp.zeros((8, LANE), jnp.float32).at[0].set(_pad1d(params["bfc"]))
    return wslab, vslab, wfc_pad, vfc


# ---------------------------------------------------------------------------
# fused single-kernel path (all activations VMEM-resident, single-pass BN)
# ---------------------------------------------------------------------------
def _make_fused_kernel(n_real):
    # TODO(synk): the custom GINConv(in, out) wrapper's internal MLP is not in
    # the provided source; assumed Linear -> ReLU -> Linear (canonical GIN).

    def kernel(a_ref, x_ref, w_ref, v_ref, wfc_ref, vfc_ref, pool_ref,
               out_ref, node_ref, graph_ref):
        n_pad = x_ref.shape[0]
        rows = jax.lax.broadcasted_iota(jnp.int32, (n_pad, LANE), 0)
        mask = (rows < n_real).astype(jnp.float32)
        inv_n = 1.0 / float(n_real)

        a = a_ref[...]                                    # (n_pad, n_pad) bf16
        h = x_ref[...].astype(jnp.float32)                # (n_pad, LANE)

        for layer in range(NUM_LAYERS):                   # static unroll
            v = v_ref[layer]                              # (8, LANE) f32
            # GIN sum aggregation + (1 + eps) * self term.
            agg = jnp.dot(a, h.astype(jnp.bfloat16),
                          preferred_element_type=jnp.float32)
            agg = agg + (1.0 + GIN_EPS) * h
            # GINConv MLP: Linear -> ReLU -> Linear (f32 accumulate).
            y = jnp.dot(agg.astype(jnp.bfloat16), w_ref[2 * layer],
                        preferred_element_type=jnp.float32) + v[0:1, :]
            y = jnp.maximum(y, 0.0)
            z = jnp.dot(y.astype(jnp.bfloat16), w_ref[2 * layer + 1],
                        preferred_element_type=jnp.float32) + v[1:2, :]
            # BatchNorm1d (training-mode batch stats, biased variance) + ReLU.
            # Single pass: every row is on-chip; padded rows are masked out.
            zm = z * mask
            mean = jnp.sum(zm, axis=0, keepdims=True) * inv_n
            var = jnp.sum(zm * zm, axis=0, keepdims=True) * inv_n - mean * mean
            var = jnp.maximum(var, 0.0)
            scale = v[2:3, :] * jax.lax.rsqrt(var + BN_EPS)
            shift = v[3:4, :] - mean * scale
            h = jnp.maximum(z * scale + shift, 0.0)       # dropout(p=0) == id

        hb = h.astype(jnp.bfloat16)
        node_ref[...] = hb                                # bf16 store stream
        # global_add_pool as one-hot pool matmul, then fc.
        graph = jnp.dot(pool_ref[...], hb, preferred_element_type=jnp.float32)
        graph_ref[...] = graph
        out_ref[...] = jnp.dot(graph.astype(jnp.bfloat16), wfc_ref[...],
                               preferred_element_type=jnp.float32) + vfc_ref[0:1, :]

    return kernel


def _forward_fused(x, edge_index, batch, params, num_graphs):
    n_real = x.shape[0]
    n_pad = max(LANE, _round_up(n_real, LANE))
    b_pad = max(8, _round_up(num_graphs, 8))
    src, dst = edge_index[0], edge_index[1]

    # Padded operands built directly at padded size (no f32 NxN intermediate).
    a_pad = jnp.zeros((n_pad, n_pad), jnp.bfloat16).at[dst, src].add(1.0)
    pool_pad = (jnp.zeros((b_pad, n_pad), jnp.bfloat16)
                .at[batch, jnp.arange(n_real)].set(1.0))
    x_pad = (jnp.zeros((n_pad, LANE), jnp.bfloat16)
             .at[:n_real, :NUM_FEATURES].set(x.astype(jnp.bfloat16)))

    wslab, vslab, wfc_pad, vfc = _pack_params(params)

    grid_spec = pltpu.PrefetchScalarGridSpec(
        num_scalar_prefetch=0,
        grid=(1,),
        in_specs=[
            pl.BlockSpec((n_pad, n_pad), lambda i: (0, 0)),            # A
            pl.BlockSpec((n_pad, LANE), lambda i: (0, 0)),             # X
            pl.BlockSpec((2 * NUM_LAYERS, LANE, LANE),
                         lambda i: (0, 0, 0)),                         # weights
            pl.BlockSpec((NUM_LAYERS, 8, LANE), lambda i: (0, 0, 0)),  # vectors
            pl.BlockSpec((LANE, LANE), lambda i: (0, 0)),              # fc W
            pl.BlockSpec((8, LANE), lambda i: (0, 0)),                 # fc bias
            pl.BlockSpec((b_pad, n_pad), lambda i: (0, 0)),            # pool
        ],
        out_specs=[
            pl.BlockSpec((b_pad, LANE), lambda i: (0, 0)),             # logits
            pl.BlockSpec((n_pad, LANE), lambda i: (0, 0)),             # nodes
            pl.BlockSpec((b_pad, LANE), lambda i: (0, 0)),             # graphs
        ],
    )
    out_p, node_p, graph_p = pl.pallas_call(
        _make_fused_kernel(n_real),
        out_shape=(jax.ShapeDtypeStruct((b_pad, LANE), jnp.float32),
                   jax.ShapeDtypeStruct((n_pad, LANE), jnp.bfloat16),
                   jax.ShapeDtypeStruct((b_pad, LANE), jnp.float32)),
        grid_spec=grid_spec,
        compiler_params=pltpu.CompilerParams(
            dimension_semantics=("arbitrary",),
            vmem_limit_bytes=VMEM_LIMIT),
    )(a_pad, x_pad, wslab, vslab, wfc_pad, vfc, pool_pad)

    out = out_p[:num_graphs, :NUM_CLASSES]
    node_embs = node_p[:n_real, :HIDDEN].astype(jnp.float32)
    graph_emb = graph_p[:num_graphs, :HIDDEN]
    return out, node_embs, graph_emb


# ---------------------------------------------------------------------------
# block-sparse tiled path (large batches): per-layer kernel + pool/fc kernel
# ---------------------------------------------------------------------------
def _make_tiled_layer_kernel(n_real):
    def kernel(cols_ref, cnt_ref, a_ref, h_ref, w_ref, v_ref,
               z_ref, stats_ref, acc_ref):
        i = pl.program_id(0)
        k = pl.program_id(1)

        # k == 0: seed the accumulator with the (1 + eps) * self term.
        @pl.when(k == 0)
        def _():
            off_i = pl.multiple_of(i * TM, TM)
            acc_ref[...] = ((1.0 + GIN_EPS)
                            * h_ref[pl.ds(off_i, TM), :].astype(jnp.float32))

        # Accumulate only the nonzero A block-columns of this row tile.
        @pl.when(k < cnt_ref[i])
        def _():
            col = cols_ref[i, k]
            off_k = pl.multiple_of(col * TM, TM)
            a_bf = a_ref[...].astype(jnp.float32).astype(jnp.bfloat16)
            acc_ref[...] += jnp.dot(a_bf, h_ref[pl.ds(off_k, TM), :],
                                    preferred_element_type=jnp.float32)

        @pl.when(k == pl.num_programs(1) - 1)
        def _():
            v = v_ref[...]
            agg = acc_ref[...].astype(jnp.bfloat16)
            # GINConv MLP: Linear -> ReLU -> Linear (f32 accumulate).
            y = jnp.maximum(jnp.dot(agg, w_ref[0],
                                    preferred_element_type=jnp.float32)
                            + v[0:1, :], 0.0)
            z = jnp.dot(y.astype(jnp.bfloat16), w_ref[1],
                        preferred_element_type=jnp.float32) + v[1:2, :]
            z_ref[...] = z.astype(jnp.bfloat16)
            # Masked partial BatchNorm statistics (real nodes only).
            rows = jax.lax.broadcasted_iota(jnp.int32, z.shape, 0) + i * TM
            mask = (rows < n_real).astype(jnp.float32)
            zm = z * mask
            stats_ref[0] = jnp.concatenate(
                [jnp.sum(zm, axis=0, keepdims=True),
                 jnp.sum(zm * zm, axis=0, keepdims=True)], axis=0)

    return kernel


def _tiled_gin_layer(cols, counts, a_i8, h, wpack, vpack, n_real):
    n_pad = h.shape[0]
    nt = n_pad // TM
    kmax = cols.shape[1]
    grid_spec = pltpu.PrefetchScalarGridSpec(
        num_scalar_prefetch=2,
        grid=(nt, kmax),
        in_specs=[
            # A tile indexed through the prefetched nonzero-block-column table.
            pl.BlockSpec((TM, TM), lambda i, k, cols, cnt: (i, cols[i, k])),
            # H fully VMEM-resident (constant index => DMA'd once).
            pl.BlockSpec((n_pad, LANE), lambda i, k, cols, cnt: (0, 0)),
            pl.BlockSpec((2, LANE, LANE), lambda i, k, cols, cnt: (0, 0, 0)),
            pl.BlockSpec((8, LANE), lambda i, k, cols, cnt: (0, 0)),
        ],
        out_specs=[
            pl.BlockSpec((TM, LANE), lambda i, k, cols, cnt: (i, 0)),
            pl.BlockSpec((1, 2, LANE), lambda i, k, cols, cnt: (i, 0, 0)),
        ],
        scratch_shapes=[pltpu.VMEM((TM, LANE), jnp.float32)],
    )
    return pl.pallas_call(
        _make_tiled_layer_kernel(n_real),
        out_shape=(jax.ShapeDtypeStruct((n_pad, LANE), jnp.bfloat16),
                   jax.ShapeDtypeStruct((nt, 2, LANE), jnp.float32)),
        grid_spec=grid_spec,
        compiler_params=pltpu.CompilerParams(
            dimension_semantics=("parallel", "arbitrary"),
            vmem_limit_bytes=VMEM_LIMIT),
    )(cols, counts, a_i8, h, wpack, vpack)


def _bn_relu(z, stats, gamma, beta, n_real):
    """Finalize two-pass BatchNorm (tiny cross-tile reduce) + ReLU, bf16 out.

    Negligible XLA glue for the large-N regime this path targets.
    """
    ssum = jnp.sum(stats[:, 0, :], axis=0)
    ssq = jnp.sum(stats[:, 1, :], axis=0)
    mean = ssum / n_real
    var = jnp.maximum(ssq / n_real - mean * mean, 0.0)     # biased variance
    scale = _pad1d(gamma) * jax.lax.rsqrt(var + BN_EPS)
    shift = _pad1d(beta) - mean * scale
    h = jnp.maximum(z.astype(jnp.float32) * scale[None, :] + shift[None, :], 0.0)
    return h.astype(jnp.bfloat16)


def _pool_fc_kernel(h_ref, pool_ref, wfc_ref, v_ref, out_ref, graph_ref):
    i = pl.program_id(0)

    @pl.when(i == 0)
    def _():
        graph_ref[...] = jnp.zeros_like(graph_ref)

    # global_add_pool: one-hot(batch) @ H, accumulated tile by tile.
    graph_ref[...] += jnp.dot(pool_ref[...], h_ref[...],
                              preferred_element_type=jnp.float32)

    @pl.when(i == pl.num_programs(0) - 1)
    def _():
        out_ref[...] = jnp.dot(graph_ref[...].astype(jnp.bfloat16), wfc_ref[...],
                               preferred_element_type=jnp.float32) + v_ref[0:1, :]


def _pool_fc(h, pool_pad, wfc_pad, vfc):
    n_pad = h.shape[0]
    b_pad = pool_pad.shape[0]
    nt = n_pad // TM
    grid_spec = pltpu.PrefetchScalarGridSpec(
        num_scalar_prefetch=0,
        grid=(nt,),
        in_specs=[
            pl.BlockSpec((TM, LANE), lambda i: (i, 0)),     # H row tile
            pl.BlockSpec((b_pad, TM), lambda i: (0, i)),    # pool columns
            pl.BlockSpec((LANE, LANE), lambda i: (0, 0)),   # fc weight
            pl.BlockSpec((8, LANE), lambda i: (0, 0)),      # fc bias
        ],
        out_specs=[
            pl.BlockSpec((b_pad, LANE), lambda i: (0, 0)),  # logits
            pl.BlockSpec((b_pad, LANE), lambda i: (0, 0)),  # graph embeddings
        ],
    )
    return pl.pallas_call(
        _pool_fc_kernel,
        out_shape=(jax.ShapeDtypeStruct((b_pad, LANE), jnp.float32),
                   jax.ShapeDtypeStruct((b_pad, LANE), jnp.float32)),
        grid_spec=grid_spec,
        compiler_params=pltpu.CompilerParams(
            dimension_semantics=("arbitrary",),
            vmem_limit_bytes=VMEM_LIMIT),
    )(h, pool_pad, wfc_pad, vfc)


def _forward_tiled(x, edge_index, batch, params, num_graphs):
    n_real = x.shape[0]
    n_pad = max(TM, _round_up(n_real, TM))
    nt = n_pad // TM
    b_pad = max(8, _round_up(num_graphs, 8))
    src, dst = edge_index[0], edge_index[1]

    # 8-bit adjacency (0/1 exact), built directly at padded size.
    a_i8 = jnp.zeros((n_pad, n_pad), jnp.int8).at[dst, src].add(1)
    pool_pad = (jnp.zeros((b_pad, n_pad), jnp.bfloat16)
                .at[batch, jnp.arange(n_real)].set(1.0))
    x_pad = (jnp.zeros((n_pad, LANE), jnp.bfloat16)
             .at[:n_real, :NUM_FEATURES].set(x.astype(jnp.bfloat16)))

    # Block-sparsity structure of A (disjoint graphs => block-diagonal-ish).
    # TODO(synk): kmax requires concrete (non-traced) edge_index; pass a static
    # bound explicitly if this wrapper is ever jitted.
    nz = jnp.zeros((nt, nt), jnp.int32).at[dst // TM, src // TM].add(1) > 0
    counts = jnp.sum(nz, axis=1).astype(jnp.int32)
    kmax = max(int(jnp.max(counts)), 1)
    cols_sorted = jnp.argsort((~nz).astype(jnp.int32), axis=1).astype(jnp.int32)
    pos = jnp.minimum(jnp.arange(kmax, dtype=jnp.int32)[None, :],
                      jnp.maximum(counts - 1, 0)[:, None])
    cols = jnp.take_along_axis(cols_sorted, pos, axis=1)

    wslab, vslab, wfc_pad, vfc = _pack_params(params)

    h = x_pad
    for layer in range(NUM_LAYERS):
        p = params["layers"][layer]
        wpack = wslab[2 * layer:2 * layer + 2]
        vpack = vslab[layer]
        z, stats = _tiled_gin_layer(cols, counts, a_i8, h, wpack, vpack, n_real)
        h = _bn_relu(z, stats, p["gamma"], p["beta"], n_real)

    out_p, graph_p = _pool_fc(h, pool_pad, wfc_pad, vfc)
    out = out_p[:num_graphs, :NUM_CLASSES]
    node_embs = h[:n_real, :HIDDEN].astype(jnp.float32)
    graph_emb = graph_p[:num_graphs, :HIDDEN]
    return out, node_embs, graph_emb


# ---------------------------------------------------------------------------
# public entry point / params / demo
# ---------------------------------------------------------------------------
def gin_forward(x, edge_index, batch, params, num_graphs, force_tiled=False):
    if (not force_tiled) and x.shape[0] <= FUSED_MAX_NODES:
        return _forward_fused(x, edge_index, batch, params, num_graphs)
    return _forward_tiled(x, edge_index, batch, params, num_graphs)


def init_params(key):
    dims = [(NUM_FEATURES, HIDDEN)] + [(HIDDEN, HIDDEN)] * (NUM_LAYERS - 1)
    keys = jax.random.split(key, 4 * NUM_LAYERS + 1)
    layers = []
    for l, (din, dout) in enumerate(dims):
        k1, k2, k3, k4 = keys[4 * l: 4 * l + 4]
        layers.append({
            "w1": 0.1 * jax.random.normal(k1, (din, dout), jnp.float32),
            "b1": 0.1 * jax.random.normal(k2, (dout,), jnp.float32),
            "w2": 0.1 * jax.random.normal(k3, (dout, dout), jnp.float32),
            "b2": 0.1 * jax.random.normal(k4, (dout,), jnp.float32),
            "gamma": jnp.ones((dout,), jnp.float32),
            "beta": jnp.zeros((dout,), jnp.float32),
        })
    return {
        "layers": layers,
        "wfc": 0.1 * jax.random.normal(keys[-1], (HIDDEN, NUM_CLASSES),
                                       jnp.float32),
        "bfc": jnp.zeros((NUM_CLASSES,), jnp.float32),
    }


def make_ring_edges(offset, n):
    i = jnp.arange(n)
    src = i + offset
    dst = (i + 1) % n + offset
    return jnp.stack([jnp.concatenate([src, dst]),
                      jnp.concatenate([dst, src])], axis=0)


def build_batch(key, nodes_per_graph, num_graphs):
    n = nodes_per_graph * num_graphs
    x = jax.random.normal(key, (n, NUM_FEATURES), jnp.float32)
    ei = jnp.concatenate(
        [make_ring_edges(g * nodes_per_graph, nodes_per_graph)
         for g in range(num_graphs)], axis=1).astype(jnp.int32)
    b = jnp.repeat(jnp.arange(num_graphs, dtype=jnp.int32), nodes_per_graph)
    return x, ei, b


if __name__ == "__main__":
    key = jax.random.PRNGKey(0)
    k_x1, k_x2, k_p = jax.random.split(key, 3)
    params = init_params(k_p)

    # 1) small demo batch (2 graphs x 8 nodes) -> fused single-kernel path.
    x, ei, b = build_batch(k_x1, 8, 2)
    out, node_embs, graph_emb = gin_forward(x, ei, b, params, 2)
    jax.block_until_ready((out, node_embs, graph_emb))
    assert out.shape == (2, NUM_CLASSES)
    assert node_embs.shape == (16, HIDDEN)
    assert graph_emb.shape == (2, HIDDEN)
    assert bool(jnp.all(jnp.isfinite(out)))
    assert bool(jnp.all(jnp.isfinite(node_embs)))
    assert bool(jnp.all(jnp.isfinite(graph_emb)))

    # 2) larger batch (12 graphs x 40 nodes): fused and block-sparse tiled
    #    paths must agree (bf16-level tolerance).
    x2, ei2, b2 = build_batch(k_x2, 40, 12)
    out_f, node_f, graph_f = gin_forward(x2, ei2, b2, params, 12)
    out_t, node_t, graph_t = gin_forward(x2, ei2, b2, params, 12,
                                         force_tiled=True)
    jax.block_until_ready((out_f, node_f, graph_f, out_t, node_t, graph_t))
    assert out_t.shape == (12, NUM_CLASSES)
    assert bool(jnp.all(jnp.isfinite(out_t)))
    assert bool(jnp.all(jnp.isfinite(node_t)))
    assert bool(jnp.all(jnp.isfinite(graph_t)))
    assert bool(jnp.allclose(out_f, out_t, rtol=0.2, atol=0.5))
    assert bool(jnp.allclose(graph_f, graph_t, rtol=0.2, atol=0.5))
    assert bool(jnp.allclose(node_f, node_t, rtol=0.2, atol=0.5))

    print("KERNEL_OK")
</pallas_src>

<mosaic_0001>
module attributes {stable_mosaic.version = 11 : i64} {
  func.func @kernel(%arg0: i32, %arg1: memref<128x128xbf16, #tpu.memory_space<vmem>>, %arg2: memref<128x128xbf16, #tpu.memory_space<vmem>>, %arg3: memref<6x128x128xbf16, #tpu.memory_space<vmem>>, %arg4: memref<3x8x128xf32, #tpu.memory_space<vmem>>, %arg5: memref<128x128xbf16, #tpu.memory_space<vmem>>, %arg6: memref<8x128xf32, #tpu.memory_space<vmem>>, %arg7: memref<8x128xbf16, #tpu.memory_space<vmem>>, %arg8: memref<8x128xf32, #tpu.memory_space<vmem>>, %arg9: memref<128x128xbf16, #tpu.memory_space<vmem>>, %arg10: memref<8x128xf32, #tpu.memory_space<vmem>>) attributes {dimension_semantics = [#tpu.dimension_semantics<arbitrary>], iteration_bounds = array<i64: 1>, scalar_prefetch = 0 : i64, scratch_operands = 0 : i64, tpu.core_type = #tpu.core_type<tc>, window_params = [{pipeline_mode = #tpu.pipeline_mode<synchronous>, transform_indices = @transform_0, window_bounds = array<i64: 128, 128>}, {pipeline_mode = #tpu.pipeline_mode<synchronous>, transform_indices = @transform_1, window_bounds = array<i64: 128, 128>}, {pipeline_mode = #tpu.pipeline_mode<synchronous>, transform_indices = @transform_2, window_bounds = array<i64: 6, 128, 128>}, {pipeline_mode = #tpu.pipeline_mode<synchronous>, transform_indices = @transform_3, window_bounds = array<i64: 3, 8, 128>}, {pipeline_mode = #tpu.pipeline_mode<synchronous>, transform_indices = @transform_4, window_bounds = array<i64: 128, 128>}, {pipeline_mode = #tpu.pipeline_mode<synchronous>, transform_indices = @transform_5, window_bounds = array<i64: 8, 128>}, {pipeline_mode = #tpu.pipeline_mode<synchronous>, transform_indices = @transform_6, window_bounds = array<i64: 8, 128>}, {pipeline_mode = #tpu.pipeline_mode<synchronous>, transform_indices = @transform_7, window_bounds = array<i64: 8, 128>}, {pipeline_mode = #tpu.pipeline_mode<synchronous>, transform_indices = @transform_8, window_bounds = array<i64: 128, 128>}, {pipeline_mode = #tpu.pipeline_mode<synchronous>, transform_indices = @transform_9, window_bounds = array<i64: 8, 128>}]} {
    %0 = tpu.iota {dimensions = array<i32: 0>} : vector<128x128xi32>
    %c16_i32 = arith.constant 16 : i32
    %1 = vector.broadcast %c16_i32 : i32 to vector<128x128xi32>
    %2 = arith.cmpi slt, %0, %1 : vector<128x128xi32>
    %3 = arith.extui %2 : vector<128x128xi1> to vector<128x128xi32>
    %4 = arith.sitofp %3 : vector<128x128xi32> to vector<128x128xf32>
    %c0 = arith.constant 0 : index
    %c0_0 = arith.constant 0 : index
    %5 = vector.load %arg1[%c0, %c0_0] : memref<128x128xbf16, #tpu.memory_space<vmem>>, vector<128x128xbf16>
    %c0_1 = arith.constant 0 : index
    %c0_2 = arith.constant 0 : index
    %6 = vector.load %arg2[%c0_1, %c0_2] : memref<128x128xbf16, #tpu.memory_space<vmem>>, vector<128x128xbf16>
    %7 = arith.extf %6 : vector<128x128xbf16> to vector<128x128xf32>
    %c0_3 = arith.constant 0 : index
    %c0_4 = arith.constant 0 : index
    %c0_5 = arith.constant 0 : index
    %8 = vector.load %arg4[%c0_3, %c0_4, %c0_5] : memref<3x8x128xf32, #tpu.memory_space<vmem>>, vector<1x8x128xf32>
    %9 = vector.shape_cast %8 : vector<1x8x128xf32> to vector<8x128xf32>
    %10 = arith.truncf %7 : vector<128x128xf32> to vector<128x128xbf16>
    %cst = arith.constant dense<0.000000e+00> : vector<128x128xf32>
    %11 = tpu.matmul %5, %10, %cst {dimension_numbers = #tpu.dot_dimension_numbers<[1], [0], [0], [1], [0, 0, 1, 1], [], []>} : vector<128x128xbf16>, vector<128x128xbf16>, vector<128x128xf32> -> vector<128x128xf32>
    %cst_6 = arith.constant 1.000000e+00 : f32
    %12 = vector.broadcast %cst_6 : f32 to vector<128x128xf32>
    %13 = arith.mulf %12, %7 : vector<128x128xf32>
    %14 = arith.addf %11, %13 : vector<128x128xf32>
    %15 = arith.truncf %14 : vector<128x128xf32> to vector<128x128xbf16>
    %c0_7 = arith.constant 0 : index
    %c0_8 = arith.constant 0 : index
    %c0_9 = arith.constant 0 : index
    %16 = vector.load %arg3[%c0_7, %c0_8, %c0_9] : memref<6x128x128xbf16, #tpu.memory_space<vmem>>, vector<1x128x128xbf16>
    %17 = vector.shape_cast %16 : vector<1x128x128xbf16> to vector<128x128xbf16>
    %cst_10 = arith.constant dense<0.000000e+00> : vector<128x128xf32>
    %18 = tpu.matmul %15, %17, %cst_10 {dimension_numbers = #tpu.dot_dimension_numbers<[1], [0], [0], [1], [0, 0, 1, 1], [], []>} : vector<128x128xbf16>, vector<128x128xbf16>, vector<128x128xf32> -> vector<128x128xf32>
    %19 = vector.extract_strided_slice %9 {offsets = [0, 0], sizes = [1, 128], strides = [1, 1]} : vector<8x128xf32> to vector<1x128xf32>
    %20 = vector.broadcast %19 : vector<1x128xf32> to vector<128x128xf32>
    %21 = arith.addf %18, %20 : vector<128x128xf32>
    %cst_11 = arith.constant 0.000000e+00 : f32
    %22 = vector.broadcast %cst_11 : f32 to vector<128x128xf32>
    %23 = arith.maximumf %21, %22 : vector<128x128xf32>
    %24 = arith.truncf %23 : vector<128x128xf32> to vector<128x128xbf16>
    %c1 = arith.constant 1 : index
    %c0_12 = arith.constant 0 : index
    %c0_13 = arith.constant 0 : index
    %25 = vector.load %arg3[%c1, %c0_12, %c0_13] : memref<6x128x128xbf16, #tpu.memory_space<vmem>>, vector<1x128x128xbf16>
    %26 = vector.shape_cast %25 : vector<1x128x128xbf16> to vector<128x128xbf16>
    %cst_14 = arith.constant dense<0.000000e+00> : vector<128x128xf32>
    %27 = tpu.matmul %24, %26, %cst_14 {dimension_numbers = #tpu.dot_dimension_numbers<[1], [0], [0], [1], [0, 0, 1, 1], [], []>} : vector<128x128xbf16>, vector<128x128xbf16>, vector<128x128xf32> -> vector<128x128xf32>
    %28 = vector.extract_strided_slice %9 {offsets = [1, 0], sizes = [1, 128], strides = [1, 1]} : vector<8x128xf32> to vector<1x128xf32>
    %29 = vector.broadcast %28 : vector<1x128xf32> to vector<128x128xf32>
    %30 = arith.addf %27, %29 : vector<128x128xf32>
    %31 = arith.mulf %30, %4 : vector<128x128xf32>
    %cst_15 = arith.constant dense<0.000000e+00> : vector<128xf32>
    %32 = vector.multi_reduction <add>, %31, %cst_15 [0] : vector<128x128xf32> to vector<128xf32>
    %33 = vector.shape_cast %32 : vector<128xf32> to vector<1x128xf32>
    %cst_16 = arith.constant 6.250000e-02 : f32
    %34 = vector.broadcast %cst_16 : f32 to vector<1x128xf32>
    %35 = arith.mulf %33, %34 : vector<1x128xf32>
    %36 = arith.mulf %31, %31 : vector<128x128xf32>
    %cst_17 = arith.constant dense<0.000000e+00> : vector<128xf32>
    %37 = vector.multi_reduction <add>, %36, %cst_17 [0] : vector<128x128xf32> to vector<128xf32>
    %38 = vector.shape_cast %37 : vector<128xf32> to vector<1x128xf32>
    %cst_18 = arith.constant 6.250000e-02 : f32
    %39 = vector.broadcast %cst_18 : f32 to vector<1x128xf32>
    %40 = arith.mulf %38, %39 : vector<1x128xf32>
    %41 = arith.mulf %35, %35 : vector<1x128xf32>
    %42 = arith.subf %40, %41 : vector<1x128xf32>
    %cst_19 = arith.constant 0.000000e+00 : f32
    %43 = vector.broadcast %cst_19 : f32 to vector<1x128xf32>
    %44 = arith.maximumf %42, %43 : vector<1x128xf32>
    %45 = vector.extract_strided_slice %9 {offsets = [2, 0], sizes = [1, 128], strides = [1, 1]} : vector<8x128xf32> to vector<1x128xf32>
    %cst_20 = arith.constant 9.99999974E-6 : f32
    %46 = vector.broadcast %cst_20 : f32 to vector<1x128xf32>
    %47 = arith.addf %44, %46 : vector<1x128xf32>
    %48 = math.rsqrt %47 : vector<1x128xf32>
    %49 = arith.mulf %45, %48 : vector<1x128xf32>
    %50 = vector.extract_strided_slice %9 {offsets = [3, 0], sizes = [1, 128], strides = [1, 1]} : vector<8x128xf32> to vector<1x128xf32>
    %51 = arith.mulf %35, %49 : vector<1x128xf32>
    %52 = arith.subf %50, %51 : vector<1x128xf32>
    %53 = vector.broadcast %49 : vector<1x128xf32> to vector<128x128xf32>
    %54 = arith.mulf %30, %53 : vector<128x128xf32>
    %55 = vector.broadcast %52 : vector<1x128xf32> to vector<128x128xf32>
    %56 = arith.addf %54, %55 : vector<128x128xf32>
    %cst_21 = arith.constant 0.000000e+00 : f32
    %57 = vector.broadcast %cst_21 : f32 to vector<128x128xf32>
    %58 = arith.maximumf %56, %57 : vector<128x128xf32>
    %c1_22 = arith.constant 1 : index
    %c0_23 = arith.constant 0 : index
    %c0_24 = arith.constant 0 : index
    %59 = vector.load %arg4[%c1_22, %c0_23, %c0_24] : memref<3x8x128xf32, #tpu.memory_space<vmem>>, vector<1x8x128xf32>
    %60 = vector.shape_cast %59 : vector<1x8x128xf32> to vector<8x128xf32>
    %61 = arith.truncf %58 : vector<128x128xf32> to vector<128x128xbf16>
    %cst_25 = arith.constant dense<0.000000e+00> : vector<128x128xf32>
    %62 = tpu.matmul %5, %61, %cst_25 {dimension_numbers = #tpu.dot_dimension_numbers<[1], [0], [0], [1], [0, 0, 1, 1], [], []>} : vector<128x128xbf16>, vector<128x128xbf16>, vector<128x128xf32> -> vector<128x128xf32>
    %cst_26 = arith.constant 1.000000e+00 : f32
    %63 = vector.broadcast %cst_26 : f32 to vector<128x128xf32>
    %64 = arith.mulf %63, %58 : vector<128x128xf32>
    %65 = arith.addf %62, %64 : vector<128x128xf32>
    %66 = arith.truncf %65 : vector<128x128xf32> to vector<128x128xbf16>
    %c2 = arith.constant 2 : index
    %c0_27 = arith.constant 0 : index
    %c0_28 = arith.constant 0 : index
    %67 = vector.load %arg3[%c2, %c0_27, %c0_28] : memref<6x128x128xbf16, #tpu.memory_space<vmem>>, vector<1x128x128xbf16>
    %68 = vector.shape_cast %67 : vector<1x128x128xbf16> to vector<128x128xbf16>
    %cst_29 = arith.constant dense<0.000000e+00> : vector<128x128xf32>
    %69 = tpu.matmul %66, %68, %cst_29 {dimension_numbers = #tpu.dot_dimension_numbers<[1], [0], [0], [1], [0, 0, 1, 1], [], []>} : vector<128x128xbf16>, vector<128x128xbf16>, vector<128x128xf32> -> vector<128x128xf32>
    %70 = vector.extract_strided_slice %60 {offsets = [0, 0], sizes = [1, 128], strides = [1, 1]} : vector<8x128xf32> to vector<1x128xf32>
    %71 = vector.broadcast %70 : vector<1x128xf32> to vector<128x128xf32>
    %72 = arith.addf %69, %71 : vector<128x128xf32>
    %cst_30 = arith.constant 0.000000e+00 : f32
    %73 = vector.broadcast %cst_30 : f32 to vector<128x128xf32>
    %74 = arith.maximumf %72, %73 : vector<128x128xf32>
    %75 = arith.truncf %74 : vector<128x128xf32> to vector<128x128xbf16>
    %c3 = arith.constant 3 : index
    %c0_31 = arith.constant 0 : index
    %c0_32 = arith.constant 0 : index
    %76 = vector.load %arg3[%c3, %c0_31, %c0_32] : memref<6x128x128xbf16, #tpu.memory_space<vmem>>, vector<1x128x128xbf16>
    %77 = vector.shape_cast %76 : vector<1x128x128xbf16> to vector<128x128xbf16>
    %cst_33 = arith.constant dense<0.000000e+00> : vector<128x128xf32>
    %78 = tpu.matmul %75, %77, %cst_33 {dimension_numbers = #tpu.dot_dimension_numbers<[1], [0], [0], [1], [0, 0, 1, 1], [], []>} : vector<128x128xbf16>, vector<128x128xbf16>, vector<128x128xf32> -> vector<128x128xf32>
    %79 = vector.extract_strided_slice %60 {offsets = [1, 0], sizes = [1, 128], strides = [1, 1]} : vector<8x128xf32> to vector<1x128xf32>
    %80 = vector.broadcast %79 : vector<1x128xf32> to vector<128x128xf32>
    %81 = arith.addf %78, %80 : vector<128x128xf32>
    %82 = arith.mulf %81, %4 : vector<128x128xf32>
    %cst_34 = arith.constant dense<0.000000e+00> : vector<128xf32>
    %83 = vector.multi_reduction <add>, %82, %cst_34 [0] : vector<128x128xf32> to vector<128xf32>
    %84 = vector.shape_cast %83 : vector<128xf32> to vector<1x128xf32>
    %cst_35 = arith.constant 6.250000e-02 : f32
    %85 = vector.broadcast %cst_35 : f32 to vector<1x128xf32>
    %86 = arith.mulf %84, %85 : vector<1x128xf32>
    %87 = arith.mulf %82, %82 : vector<128x128xf32>
    %cst_36 = arith.constant dense<0.000000e+00> : vector<128xf32>
    %88 = vector.multi_reduction <add>, %87, %cst_36 [0] : vector<128x128xf32> to vector<128xf32>
    %89 = vector.shape_cast %88 : vector<128xf32> to vector<1x128xf32>
    %cst_37 = arith.constant 6.250000e-02 : f32
    %90 = vector.broadcast %cst_37 : f32 to vector<1x128xf32>
    %91 = arith.mulf %89, %90 : vector<1x128xf32>
    %92 = arith.mulf %86, %86 : vector<1x128xf32>
    %93 = arith.subf %91, %92 : vector<1x128xf32>
    %cst_38 = arith.constant 0.000000e+00 : f32
    %94 = vector.broadcast %cst_38 : f32 to vector<1x128xf32>
    %95 = arith.maximumf %93, %94 : vector<1x128xf32>
    %96 = vector.extract_strided_slice %60 {offsets = [2, 0], sizes = [1, 128], strides = [1, 1]} : vector<8x128xf32> to vector<1x128xf32>
    %cst_39 = arith.constant 9.99999974E-6 : f32
    %97 = vector.broadcast %cst_39 : f32 to vector<1x128xf32>
    %98 = arith.addf %95, %97 : vector<1x128xf32>
    %99 = math.rsqrt %98 : vector<1x128xf32>
    %100 = arith.mulf %96, %99 : vector<1x128xf32>
    %101 = vector.extract_strided_slice %60 {offsets = [3, 0], sizes = [1, 128], strides = [1, 1]} : vector<8x128xf32> to vector<1x128xf32>
    %102 = arith.mulf %86, %100 : vector<1x128xf32>
    %103 = arith.subf %101, %102 : vector<1x128xf32>
    %104 = vector.broadcast %100 : vector<1x128xf32> to vector<128x128xf32>
    %105 = arith.mulf %81, %104 : vector<128x128xf32>
    %106 = vector.broadcast %103 : vector<1x128xf32> to vector<128x128xf32>
    %107 = arith.addf %105, %106 : vector<128x128xf32>
    %cst_40 = arith.constant 0.000000e+00 : f32
    %108 = vector.broadcast %cst_40 : f32 to vector<128x128xf32>
    %109 = arith.maximumf %107, %108 : vector<128x128xf32>
    %c2_41 = arith.constant 2 : index
    %c0_42 = arith.constant 0 : index
    %c0_43 = arith.constant 0 : index
    %110 = vector.load %arg4[%c2_41, %c0_42, %c0_43] : memref<3x8x128xf32, #tpu.memory_space<vmem>>, vector<1x8x128xf32>
    %111 = vector.shape_cast %110 : vector<1x8x128xf32> to vector<8x128xf32>
    %112 = arith.truncf %109 : vector<128x128xf32> to vector<128x128xbf16>
    %cst_44 = arith.constant dense<0.000000e+00> : vector<128x128xf32>
    %113 = tpu.matmul %5, %112, %cst_44 {dimension_numbers = #tpu.dot_dimension_numbers<[1], [0], [0], [1], [0, 0, 1, 1], [], []>} : vector<128x128xbf16>, vector<128x128xbf16>, vector<128x128xf32> -> vector<128x128xf32>
    %cst_45 = arith.constant 1.000000e+00 : f32
    %114 = vector.broadcast %cst_45 : f32 to vector<128x128xf32>
    %115 = arith.mulf %114, %109 : vector<128x128xf32>
    %116 = arith.addf %113, %115 : vector<128x128xf32>
    %117 = arith.truncf %116 : vector<128x128xf32> to vector<128x128xbf16>
    %c4 = arith.constant 4 : index
    %c0_46 = arith.constant 0 : index
    %c0_47 = arith.constant 0 : index
    %118 = vector.load %arg3[%c4, %c0_46, %c0_47] : memref<6x128x128xbf16, #tpu.memory_space<vmem>>, vector<1x128x128xbf16>
    %119 = vector.shape_cast %118 : vector<1x128x128xbf16> to vector<128x128xbf16>
    %cst_48 = arith.constant dense<0.000000e+00> : vector<128x128xf32>
    %120 = tpu.matmul %117, %119, %cst_48 {dimension_numbers = #tpu.dot_dimension_numbers<[1], [0], [0], [1], [0, 0, 1, 1], [], []>} : vector<128x128xbf16>, vector<128x128xbf16>, vector<128x128xf32> -> vector<128x128xf32>
    %121 = vector.extract_strided_slice %111 {offsets = [0, 0], sizes = [1, 128], strides = [1, 1]} : vector<8x128xf32> to vector<1x128xf32>
    %122 = vector.broadcast %121 : vector<1x128xf32> to vector<128x128xf32>
    %123 = arith.addf %120, %122 : vector<128x128xf32>
    %cst_49 = arith.constant 0.000000e+00 : f32
    %124 = vector.broadcast %cst_49 : f32 to vector<128x128xf32>
    %125 = arith.maximumf %123, %124 : vector<128x128xf32>
    %126 = arith.truncf %125 : vector<128x128xf32> to vector<128x128xbf16>
    %c5 = arith.constant 5 : index
    %c0_50 = arith.constant 0 : index
    %c0_51 = arith.constant 0 : index
    %127 = vector.load %arg3[%c5, %c0_50, %c0_51] : memref<6x128x128xbf16, #tpu.memory_space<vmem>>, vector<1x128x128xbf16>
    %128 = vector.shape_cast %127 : vector<1x128x128xbf16> to vector<128x128xbf16>
    %cst_52 = arith.constant dense<0.000000e+00> : vector<128x128xf32>
    %129 = tpu.matmul %126, %128, %cst_52 {dimension_numbers = #tpu.dot_dimension_numbers<[1], [0], [0], [1], [0, 0, 1, 1], [], []>} : vector<128x128xbf16>, vector<128x128xbf16>, vector<128x128xf32> -> vector<128x128xf32>
    %130 = vector.extract_strided_slice %111 {offsets = [1, 0], sizes = [1, 128], strides = [1, 1]} : vector<8x128xf32> to vector<1x128xf32>
    %131 = vector.broadcast %130 : vector<1x128xf32> to vector<128x128xf32>
    %132 = arith.addf %129, %131 : vector<128x128xf32>
    %133 = arith.mulf %132, %4 : vector<128x128xf32>
    %cst_53 = arith.constant dense<0.000000e+00> : vector<128xf32>
    %134 = vector.multi_reduction <add>, %133, %cst_53 [0] : vector<128x128xf32> to vector<128xf32>
    %135 = vector.shape_cast %134 : vector<128xf32> to vector<1x128xf32>
    %cst_54 = arith.constant 6.250000e-02 : f32
    %136 = vector.broadcast %cst_54 : f32 to vector<1x128xf32>
    %137 = arith.mulf %135, %136 : vector<1x128xf32>
    %138 = arith.mulf %133, %133 : vector<128x128xf32>
    %cst_55 = arith.constant dense<0.000000e+00> : vector<128xf32>
    %139 = vector.multi_reduction <add>, %138, %cst_55 [0] : vector<128x128xf32> to vector<128xf32>
    %140 = vector.shape_cast %139 : vector<128xf32> to vector<1x128xf32>
    %cst_56 = arith.constant 6.250000e-02 : f32
    %141 = vector.broadcast %cst_56 : f32 to vector<1x128xf32>
    %142 = arith.mulf %140, %141 : vector<1x128xf32>
    %143 = arith.mulf %137, %137 : vector<1x128xf32>
    %144 = arith.subf %142, %143 : vector<1x128xf32>
    %cst_57 = arith.constant 0.000000e+00 : f32
    %145 = vector.broadcast %cst_57 : f32 to vector<1x128xf32>
    %146 = arith.maximumf %144, %145 : vector<1x128xf32>
    %147 = vector.extract_strided_slice %111 {offsets = [2, 0], sizes = [1, 128], strides = [1, 1]} : vector<8x128xf32> to vector<1x128xf32>
    %cst_58 = arith.constant 9.99999974E-6 : f32
    %148 = vector.broadcast %cst_58 : f32 to vector<1x128xf32>
    %149 = arith.addf %146, %148 : vector<1x128xf32>
    %150 = math.rsqrt %149 : vector<1x128xf32>
    %151 = arith.mulf %147, %150 : vector<1x128xf32>
    %152 = vector.extract_strided_slice %111 {offsets = [3, 0], sizes = [1, 128], strides = [1, 1]} : vector<8x128xf32> to vector<1x128xf32>
    %153 = arith.mulf %137, %151 : vector<1x128xf32>
    %154 = arith.subf %152, %153 : vector<1x128xf32>
    %155 = vector.broadcast %151 : vector<1x128xf32> to vector<128x128xf32>
    %156 = arith.mulf %132, %155 : vector<128x128xf32>
    %157 = vector.broadcast %154 : vector<1x128xf32> to vector<128x128xf32>
    %158 = arith.addf %156, %157 : vector<128x128xf32>
    %cst_59 = arith.constant 0.000000e+00 : f32
    %159 = vector.broadcast %cst_59 : f32 to vector<128x128xf32>
    %160 = arith.maximumf %158, %159 : vector<128x128xf32>
    %161 = arith.truncf %160 : vector<128x128xf32> to vector<128x128xbf16>
    %c0_60 = arith.constant 0 : index
    %c0_61 = arith.constant 0 : index
    %162 = vector.load %arg9[%c0_60, %c0_61] : memref<128x128xbf16, #tpu.memory_space<vmem>>, vector<128x128xbf16>
    tpu.vector_store %arg9[%c0_60, %c0_61], %161 {strides = array<i32>} : memref<128x128xbf16, #tpu.memory_space<vmem>>, vector<128x128xbf16>,
    %c0_62 = arith.constant 0 : index
    %c0_63 = arith.constant 0 : index
    %163 = vector.load %arg7[%c0_62, %c0_63] : memref<8x128xbf16, #tpu.memory_space<vmem>>, vector<8x128xbf16>
    %cst_64 = arith.constant dense<0.000000e+00> : vector<8x128xf32>
    %164 = tpu.matmul %163, %161, %cst_64 {dimension_numbers = #tpu.dot_dimension_numbers<[1], [0], [0], [1], [0, 0, 1, 1], [], []>} : vector<8x128xbf16>, vector<128x128xbf16>, vector<8x128xf32> -> vector<8x128xf32>
    %c0_65 = arith.constant 0 : index
    %c0_66 = arith.constant 0 : index
    %165 = vector.load %arg10[%c0_65, %c0_66] : memref<8x128xf32, #tpu.memory_space<vmem>>, vector<8x128xf32>
    tpu.vector_store %arg10[%c0_65, %c0_66], %164 {strides = array<i32>} : memref<8x128xf32, #tpu.memory_space<vmem>>, vector<8x128xf32>,
    %166 = arith.truncf %164 : vector<8x128xf32> to vector<8x128xbf16>
    %c0_67 = arith.constant 0 : index
    %c0_68 = arith.constant 0 : index
    %167 = vector.load %arg5[%c0_67, %c0_68] : memref<128x128xbf16, #tpu.memory_space<vmem>>, vector<128x128xbf16>
    %cst_69 = arith.constant dense<0.000000e+00> : vector<8x128xf32>
    %168 = tpu.matmul %166, %167, %cst_69 {dimension_numbers = #tpu.dot_dimension_numbers<[1], [0], [0], [1], [0, 0, 1, 1], [], []>} : vector<8x128xbf16>, vector<128x128xbf16>, vector<8x128xf32> -> vector<8x128xf32>
    %c0_70 = arith.constant 0 : index
    %c0_71 = arith.constant 0 : index
    %169 = vector.load %arg6[%c0_70, %c0_71] : memref<8x128xf32, #tpu.memory_space<vmem>>, vector<1x128xf32>
    %170 = vector.broadcast %169 : vector<1x128xf32> to vector<8x128xf32>
    %171 = arith.addf %168, %170 : vector<8x128xf32>
    %c0_72 = arith.constant 0 : index
    %c0_73 = arith.constant 0 : index
    %172 = vector.load %arg8[%c0_72, %c0_73] : memref<8x128xf32, #tpu.memory_space<vmem>>, vector<8x128xf32>
    tpu.vector_store %arg8[%c0_72, %c0_73], %171 {strides = array<i32>} : memref<8x128xf32, #tpu.memory_space<vmem>>, vector<8x128xf32>,
    return
  }
  func.func @transform_0(%arg0: i32) -> (i32, i32) {
    %c0_i32 = arith.constant 0 : i32
    %c0_i32_0 = arith.constant 0 : i32
    %c0_i32_1 = arith.constant 0 : i32
    return %c0_i32, %c0_i32_0 : i32, i32
  }
  func.func @transform_1(%arg0: i32) -> (i32, i32) {
    %c0_i32 = arith.constant 0 : i32
    %c0_i32_0 = arith.constant 0 : i32
    %c0_i32_1 = arith.constant 0 : i32
    return %c0_i32, %c0_i32_0 : i32, i32
  }
  func.func @transform_2(%arg0: i32) -> (i32, i32, i32) {
    %c0_i32 = arith.constant 0 : i32
    %c0_i32_0 = arith.constant 0 : i32
    %c0_i32_1 = arith.constant 0 : i32
    %c0_i32_2 = arith.constant 0 : i32
    return %c0_i32, %c0_i32_0, %c0_i32_1 : i32, i32, i32
  }
  func.func @transform_3(%arg0: i32) -> (i32, i32, i32) {
    %c0_i32 = arith.constant 0 : i32
    %c0_i32_0 = arith.constant 0 : i32
    %c0_i32_1 = arith.constant 0 : i32
    %c0_i32_2 = arith.constant 0 : i32
    return %c0_i32, %c0_i32_0, %c0_i32_1 : i32, i32, i32
  }
  func.func @transform_4(%arg0: i32) -> (i32, i32) {
    %c0_i32 = arith.constant 0 : i32
    %c0_i32_0 = arith.constant 0 : i32
    %c0_i32_1 = arith.constant 0 : i32
    return %c0_i32, %c0_i32_0 : i32, i32
  }
  func.func @transform_5(%arg0: i32) -> (i32, i32) {
    %c0_i32 = arith.constant 0 : i32
    %c0_i32_0 = arith.constant 0 : i32
    %c0_i32_1 = arith.constant 0 : i32
    return %c0_i32, %c0_i32_0 : i32, i32
  }
  func.func @transform_6(%arg0: i32) -> (i32, i32) {
    %c0_i32 = arith.constant 0 : i32
    %c0_i32_0 = arith.constant 0 : i32
    %c0_i32_1 = arith.constant 0 : i32
    return %c0_i32, %c0_i32_0 : i32, i32
  }
  func.func @transform_7(%arg0: i32) -> (i32, i32) {
    %c0_i32 = arith.constant 0 : i32
    %c0_i32_0 = arith.constant 0 : i32
    %c0_i32_1 = arith.constant 0 : i32
    return %c0_i32, %c0_i32_0 : i32, i32
  }
  func.func @transform_8(%arg0: i32) -> (i32, i32) {
    %c0_i32 = arith.constant 0 : i32
    %c0_i32_0 = arith.constant 0 : i32
    %c0_i32_1 = arith.constant 0 : i32
    return %c0_i32, %c0_i32_0 : i32, i32
  }
  func.func @transform_9(%arg0: i32) -> (i32, i32) {
    %c0_i32 = arith.constant 0 : i32
    %c0_i32_0 = arith.constant 0 : i32
    %c0_i32_1 = arith.constant 0 : i32
    return %c0_i32, %c0_i32_0 : i32, i32
  }
}

</mosaic_0001>

<bundles_post_ra>
// kernel: tpu_custom_call.1
= control target key start
LH: loop header
LB: loop body
LE: loop exit
PB: predicated region body
PF: predicated region fallthrough
CT: control target
= control target key end

     0   :  { %15 = vsyncpa [#allocation3], 0  ;;  %s4155_s0 = inlined_call_operand.hbm [shape: bf16[128,128], index: 0, kind: input, shape index: {}]   ;;  %s4156_s1 = inlined_call_operand.hbm [shape: bf16[128,128], index: 1, kind: input, shape index: {}]   ;;  %s4157_s2 = inlined_call_operand.hbm [shape: bf16[6,128,128], index: 2, kind: input, shape index: {}]   ;;  %s4158_s3 = inlined_call_operand.hbm [shape: f32[3,8,128], index: 3, kind: input, shape index: {}]   ;;  %s4159_s4 = inlined_call_operand.hbm [shape: bf16[128,128], index: 4, kind: input, shape index: {}]   ;;  %s4160_s5 = inlined_call_operand.vmem [shape: f32[8,128], index: 5, kind: input, shape index: {}]   ;;  %s4161_s6 = inlined_call_operand.vmem [shape: bf16[8,128], index: 6, kind: input, shape index: {}]   ;;  %s4162_s7 = inlined_call_operand.hbm [shape: f32[8,128], index: 7, kind: output, shape index: {0}]   ;;  %s4163_s8 = inlined_call_operand.hbm [shape: bf16[128,128], index: 8, kind: output, shape index: {1}]   ;;  %s4164_s9 = inlined_call_operand.hbm [shape: f32[8,128], index: 9, kind: output, shape index: {2}]  }
   0x1   :  { %16 = vsyncpa [#allocation6], 0 }
   0x2   :  { %17 = vsyncpa [#allocation9], 0 }
   0x3   :  { %18 = vsyncpa [#allocation4], 0 }
   0x4   :  { %19 = vsyncpa [#allocation13], 0  ;;  %s3356_s30 = smov [#allocation5]   ;;  %s3357_s11 = smov [#allocation8]  }
   0x5   :  { %s37_s10 = sshll.u32 %s3356_s30, 4  ;;  %s61_s12 = sshll.u32 %s3357_s11, 4  ;;  %s38_s10 = int_to_ptr.vmem [resolvable:$true] %s37_s10  ;;  %s3420_s12 = int_to_ptr.vmem [resolvable:$true] %s61_s12 }
   0x6   :  { %s3170_s15 = scalar_lea.hbm %s4156_s1, 1024 }
   0x7   :  { %p3171_p0 = scmp.ne.s32.totalorder %s4156_s1, %s3170_s15  ;;  %p3174_p1 = scmp.lt.u32.totalorder %s3170_s15, %s4156_s1 }
   0x9   :  { %p3176_p2 = pnand %p3174_p1, %p3171_p0 }
   0xb   :  { %3179 = shalt.err (!%p3176_p2)
}
   0xc   :  { %s3180_s20 = scalar_lea.vmem %s38_s10, 1024  ;;  %p3185_p4 = scmp.lt.s32.totalorder %s38_s10, %s38_s10 }
   0xd   :  { %p3181_p3 = scmp.ne.s32.totalorder %s38_s10, %s3180_s20  ;;  %p3186_p5 = scmp.lt.s32.totalorder %s3180_s20, %s3180_s20 }
   0xf   :  { %p3187_p6 = por %p3186_p5, %p3185_p4 }
  0x11   :  { %p3188_p7 = pnand %p3187_p6, %p3181_p3 }
  0x13   :  { %3191 = shalt.err (!%p3188_p7)
}
  0x14   :  { %s3358_s21 = smov 64   ;;  %s3359_s22 = smov 4  }
  0x15   :  { %43 = dma.hbm_to_vmem [thread:$0]  %s4156_s1, 1024, %s38_s10, [#allocation6], %s3358_s21, %s3358_s21, %s3359_s22  }
  0x16   :  { %s3192_s27 = scalar_lea.hbm %s4158_s3, 384 }
  0x17   :  { %p3193_p8 = scmp.ne.s32.totalorder %s4158_s3, %s3192_s27  ;;  %p3196_p9 = scmp.lt.u32.totalorder %s3192_s27, %s4158_s3 }
  0x19   :  { %p3198_p10 = pnand %p3196_p9, %p3193_p8 }
  0x1b   :  { %3201 = shalt.err (!%p3198_p10)
}
  0x1c   :  { %s3202_s13 = scalar_lea.vmem %s3420_s12, 384  ;;  %p3207_p12 = scmp.lt.s32.totalorder %s3420_s12, %s3420_s12 }
  0x1d   :  { %p3203_p11 = scmp.ne.s32.totalorder %s3420_s12, %s3202_s13  ;;  %p3208_p13 = scmp.lt.s32.totalorder %s3202_s13, %s3202_s13 }
  0x1f   :  { %p3209_p0 = por %p3208_p13, %p3207_p12 }
  0x21   :  { %p3210_p1 = pnand %p3209_p0, %p3203_p11 }
  0x23   :  { %3213 = shalt.err (!%p3210_p1)
}
  0x24   :  { %s3360_s1 = smov 128   ;;  %s3361_s10 = smov 8  }
  0x25   :  { %67 = dma.hbm_to_vmem [thread:$0]  %s4158_s3, 384, %s3420_s12, [#allocation9], %s3360_s1, %s3360_s1, %s3361_s10  }
  0x26   :  { %s3362_s16 = smov [#allocation2]   ;;  %s3363_s18 = smov [#allocation7]  }
  0x27   :  { %s25_s17 = sshll.u32 %s3362_s16, 4  ;;  %s49_s19 = sshll.u32 %s3363_s18, 4  ;;  %s26_s17 = int_to_ptr.vmem [resolvable:$true] %s25_s17  ;;  %s3454_s19 = int_to_ptr.vmem [resolvable:$true] %s49_s19 }
  0x28   :  { %s3214_s24 = scalar_lea.hbm %s4155_s0, 1024 }
  0x29   :  { %p3215_p2 = scmp.ne.s32.totalorder %s4155_s0, %s3214_s24  ;;  %p3218_p3 = scmp.lt.u32.totalorder %s3214_s24, %s4155_s0 }
  0x2b   :  { %p3220_p4 = pnand %p3218_p3, %p3215_p2 }
  0x2d   :  { %3223 = shalt.err (!%p3220_p4)
}
  0x2e   :  { %s3224_s3 = scalar_lea.vmem %s26_s17, 1024  ;;  %p3229_p6 = scmp.lt.s32.totalorder %s26_s17, %s26_s17 }
  0x2f   :  { %p3225_p5 = scmp.ne.s32.totalorder %s26_s17, %s3224_s3  ;;  %p3230_p7 = scmp.lt.s32.totalorder %s3224_s3, %s3224_s3 }
  0x31   :  { %p3231_p8 = por %p3230_p7, %p3229_p6 }
  0x33   :  { %p3232_p9 = pnand %p3231_p8, %p3225_p5 }
  0x35   :  { %3235 = shalt.err (!%p3232_p9)
}
  0x36   :  { %31 = dma.hbm_to_vmem [thread:$0]  %s4155_s0, 1024, %s26_s17, [#allocation3], %s3358_s21, %s3358_s21, %s3359_s22  }
  0x37   :  { %s3236_s13 = scalar_lea.hbm %s4157_s2, 6144 }
  0x38   :  { %p3237_p10 = scmp.ne.s32.totalorder %s4157_s2, %s3236_s13  ;;  %p3240_p11 = scmp.lt.u32.totalorder %s3236_s13, %s4157_s2 }
  0x3a   :  { %p3242_p12 = pnand %p3240_p11, %p3237_p10 }
  0x3c   :  { %3245 = shalt.err (!%p3242_p12)
}
  0x3d   :  { %s3246_s16 = scalar_lea.vmem %s3454_s19, 6144  ;;  %p3251_p0 = scmp.lt.s32.totalorder %s3454_s19, %s3454_s19 }
  0x3e   :  { %p3247_p13 = scmp.ne.s32.totalorder %s3454_s19, %s3246_s16  ;;  %p3252_p1 = scmp.lt.s32.totalorder %s3246_s16, %s3246_s16 }
  0x40   :  { %p3253_p2 = por %p3252_p1, %p3251_p0 }
  0x42   :  { %p3254_p3 = pnand %p3253_p2, %p3247_p13 }
  0x44   :  { %3257 = shalt.err (!%p3254_p3)
}
  0x45   :  { %55 = dma.hbm_to_vmem [thread:$0]  %s4157_s2, 6144, %s3454_s19, [#allocation6], %s3358_s21, %s3358_s21, %s3359_s22  }
  0x46   :  { %s3364_s18 = smov [#allocation10]   ;;  %s3258_s25 = scalar_lea.hbm %s4159_s4, 1024 }
  0x47   :  { %s73_s20 = sshll.u32 %s3364_s18, 4  ;;  %p3259_p4 = scmp.ne.s32.totalorder %s4159_s4, %s3258_s25  ;;  %s74_s20 = int_to_ptr.vmem [resolvable:$true] %s73_s20 }
  0x48   :  { %p3262_p5 = scmp.lt.u32.totalorder %s3258_s25, %s4159_s4 }
  0x4a   :  { %p3264_p6 = pnand %p3262_p5, %p3259_p4 }
  0x4c   :  { %3267 = shalt.err (!%p3264_p6)
}
  0x4d   :  { %s3268_s12 = scalar_lea.vmem %s74_s20, 1024  ;;  %p3273_p8 = scmp.lt.s32.totalorder %s74_s20, %s74_s20 }
  0x4e   :  { %p3269_p7 = scmp.ne.s32.totalorder %s74_s20, %s3268_s12  ;;  %p3274_p9 = scmp.lt.s32.totalorder %s3268_s12, %s3268_s12 }
  0x50   :  { %p3275_p10 = por %p3274_p9, %p3273_p8 }
  0x52   :  { %p3276_p11 = pnand %p3275_p10, %p3269_p7 }
  0x54   :  { %3279 = shalt.err (!%p3276_p11)
}
  0x55   :  { %79 = dma.hbm_to_vmem [thread:$0]  %s4159_s4, 1024, %s74_s20, [#allocation9], %s3358_s21, %s3358_s21, %s3359_s22  }
  0x56   :  { %3346 = dma.done.wait [#allocation3], 1024  }
  0x57   :  { %3347 = vsyncadd [#allocation3], 4294966272 }
  0x58   :  { %3348 = dma.done.wait [#allocation6], 7168  }
  0x59   :  { %3349 = vsyncadd [#allocation6], 4294960128 }
  0x5a   :  { %3350 = dma.done.wait [#allocation9], 1408  }
  0x5b   :  { %3351 = vsyncadd [#allocation9], 4294965888  ;;  %v3506_v0 = vld [vmem:[#allocation5] sm:$0xff]   ;;  %v3508_v1 = vld [vmem:[#allocation5 + $0x8] sm:$0xff]   ;;  %vm3366_vm0 = vmmov 0   ;;  %s3367_s30 = smov [#allocation12]  }
  0x5c   :  { %v3510_v2 = vld [vmem:[#allocation5 + $0x10] sm:$0xff]   ;;  %2734 = vmatprep.subr.bf16.mxu0 %v3506_v0  ;;  %v3513_v3 = vld [vmem:[#allocation2] sm:$0xff]   ;;  %v3518_v4 = vld [vmem:[#allocation5 + $0x18] sm:$0xff]   ;;  %v199_v30 = vunpack.c.l.bf16 %v3508_v1  ;;  %v200_v31 = vunpack.c.h.bf16 %v3508_v1  ;;  %v197_v33 = vunpack.c.l.bf16 %v3506_v0  ;;  %v198_v34 = vunpack.c.h.bf16 %v3506_v0  ;;  %s2389_s11 = sshll.u32 %s3367_s30, 4  ;;  %s2390_s11 = int_to_ptr.vmem [resolvable:$true] %s2389_s11 }
  0x5d   :  { %2735 = vmatpush3.bf16.msra.mxu0 %v3506_v0  ;;  %2750 = vmatprep.mubr.bf16.mxu0 %v3513_v3  ;;  %v3522_v5 = vld [vmem:[#allocation5 + $0x20] sm:$0xff]   ;;  %v3093_v7 = vld [vmem:[#allocation7 + $0x8] sm:$0xff]   ;;  %v3094_v9 = vld [vmem:[#allocation7 + $0x10] sm:$0xff]   ;;  %v203_v44 = vunpack.c.l.bf16 %v3518_v4  ;;  %v204_v45 = vunpack.c.h.bf16 %v3518_v4  ;;  %v201_v47 = vunpack.c.l.bf16 %v3510_v2  ;;  %v202_v48 = vunpack.c.h.bf16 %v3510_v2  ;;  %s3280_s13 = scalar_lea.vmem %s2390_s11, 1024  ;;  %p3285_p13 = scmp.lt.s32.totalorder %s2390_s11, %s2390_s11 }
  0x5e   :  { %2736 = vmatprep.subr.bf16.mxu0 %v3508_v1  ;;  %v3092_v6 = vld [vmem:[#allocation7] sm:$0xff]   ;;  %v3526_v8 = vld [vmem:[#allocation5 + $0x28] sm:$0xff]   ;;  %v3529_v10 = vld [vmem:[#allocation5 + $0x30] sm:$0xff]   ;;  %v205_v61 = vunpack.c.l.bf16 %v3522_v5  ;;  %v206_v62 = vunpack.c.h.bf16 %v3522_v5  ;;  %p3281_p12 = scmp.ne.s32.totalorder %s2390_s11, %s3280_s13  ;;  %p3286_p0 = scmp.lt.s32.totalorder %s3280_s13, %s3280_s13 }
  0x5f   :  { %2766 = vmatprep.subr.bf16.mxu1 %v3092_v6  ;;  %v3095_v11 = vld [vmem:[#allocation7 + $0x18] sm:$0xff]   ;;  %v3096_v13 = vld [vmem:[#allocation7 + $0x20] sm:$0xff]   ;;  %v3097_v14 = vld [vmem:[#allocation7 + $0x28] sm:$0xff]   ;;  %v207_v58 = vunpack.c.l.bf16 %v3526_v8  ;;  %v208_v59 = vunpack.c.h.bf16 %v3526_v8 }
  0x60   :  { %2767 = vmatpush3.bf16.msra.mxu1 %v3092_v6  ;;  %v3533_v12 = vld [vmem:[#allocation5 + $0x38] sm:$0xff]   ;;  %v3540_v15 = vld [vmem:[#allocation2 + $0x8] sm:$0xff]   ;;  %v3542_v16 = vld [vmem:[#allocation2 + $0x10] sm:$0xff]   ;;  %p3287_p1 = por %p3286_p0, %p3285_p13 }
  0x61   :  { %2737 = vmatpush3.bf16.msra.mxu0 %v3508_v1  ;;  %2768 = vmatprep.subr.bf16.mxu1 %v3093_v7  ;;  %v3547_v17 = vld [vmem:[#allocation2 + $0x18] sm:$0xff]   ;;  %v3549_v18 = vld [vmem:[#allocation2 + $0x20] sm:$0xff]   ;;  %v3553_v19 = vld [vmem:[#allocation2 + $0x28] sm:$0xff]  }
  0x62   :  { %2738 = vmatprep.subr.bf16.mxu0 %v3510_v2  ;;  %v3555_v20 = vld [vmem:[#allocation2 + $0x30] sm:$0xff]   ;;  %v3559_v21 = vld [vmem:[#allocation2 + $0x38] sm:$0xff]   ;;  %v3100_v24 = vld [vmem:[#allocation7 + $0x40] sm:$0xff]   ;;  %p3288_p2 = pnand %p3287_p1, %p3281_p12 }
  0x63   :  { %v3098_v22 = vld [vmem:[#allocation7 + $0x30] sm:$0xff]   ;;  %v3099_v23 = vld [vmem:[#allocation7 + $0x38] sm:$0xff]   ;;  %v3101_v25 = vld [vmem:[#allocation7 + $0x48] sm:$0xff]  }
  0x64   :  { %2769 = vmatpush3.bf16.msra.mxu1 %v3093_v7  ;;  %v3102_v26 = vld [vmem:[#allocation7 + $0x50] sm:$0xff]   ;;  %v3103_v27 = vld [vmem:[#allocation7 + $0x58] sm:$0xff]   ;;  %v3104_v28 = vld [vmem:[#allocation7 + $0x60] sm:$0xff]  }
  0x65   :  { %2739 = vmatpush3.bf16.msra.mxu0 %v3510_v2  ;;  %2770 = vmatprep.subr.bf16.mxu1 %v3094_v9  ;;  %v3105_v29 = vld [vmem:[#allocation7 + $0x68] sm:$0xff]  }
  0x66   :  { %2740 = vmatprep.subr.bf16.mxu0 %v3518_v4 }
  0x68   :  { %2771 = vmatpush3.bf16.msra.mxu1 %v3094_v9 }
  0x69   :  { %2741 = vmatpush3.bf16.msra.mxu0 %v3518_v4  ;;  %2772 = vmatprep.subr.bf16.mxu1 %v3095_v11 }
  0x6a   :  { %2742 = vmatprep.subr.bf16.mxu0 %v3522_v5 }
  0x6c   :  { %2773 = vmatpush3.bf16.msra.mxu1 %v3095_v11 }
  0x6d   :  { %2743 = vmatpush3.bf16.msra.mxu0 %v3522_v5  ;;  %2774 = vmatprep.subr.bf16.mxu1 %v3096_v13  ;;  %v210_v5 = vunpack.c.h.bf16 %v3529_v10 }
  0x6e   :  { %2744 = vmatprep.subr.bf16.mxu0 %v3526_v8 }
  0x70   :  { %2775 = vmatpush3.bf16.msra.mxu1 %v3096_v13  ;;  %v211_v13 = vunpack.c.l.bf16 %v3533_v12 }
  0x71   :  { %2745 = vmatpush3.bf16.msra.mxu0 %v3526_v8  ;;  %2776 = vmatprep.subr.bf16.mxu1 %v3097_v14  ;;  %v212_v8 = vunpack.c.h.bf16 %v3533_v12 }
  0x72   :  { %2746 = vmatprep.subr.bf16.mxu0 %v3529_v10 }
  0x74   :  { %2777 = vmatpush3.bf16.msra.mxu1 %v3097_v14 }
  0x75   :  { %2747 = vmatpush3.bf16.msra.mxu0 %v3529_v10  ;;  %2778 = vmatprep.subr.bf16.mxu1 %v3098_v22 }
  0x76   :  { %2748 = vmatprep.subr.bf16.mxu0 %v3533_v12 }
  0x78   :  { %2779 = vmatpush3.bf16.msra.mxu1 %v3098_v22  ;;  %v209_v22 = vunpack.c.l.bf16 %v3529_v10  ;;  %v431_v10 = vlaneseq }
  0x79   :  { %2749 = vmatpush3.bf16.msra.mxu0 %v3533_v12  ;;  %2780 = vmatprep.subr.bf16.mxu1 %v3099_v23  ;;  %v3106_v12 = vld [vmem:[#allocation7 + $0x70] sm:$0xff]  }
  0x7a   :  { %2798 = vmatprep.subr.bf16.mxu0 %v3100_v24 }
  0x7c   :  { %2751 = vmatmul.mubr.bf16.vlgmr.msra.gmra.mrb[0].mxu0 %v3540_v15  ;;  %2781 = vmatpush3.bf16.msra.mxu1 %v3099_v23 }
  0x7d   :  { %2754 = vmatprep.mubr.bf16.mxu0 %v3542_v16  ;;  %2799 = vmatpush3.bf16.msra.mxu0 %v3100_v24 }
  0x7e   :  { %2800 = vmatprep.subr.bf16.mxu0 %v3101_v25 }
  0x81   :  { %2801 = vmatpush3.bf16.msra.mxu0 %v3101_v25 }
  0x82   :  { %2802 = vmatprep.subr.bf16.mxu0 %v3102_v26 }
  0x84   :  { %2755 = vmatmul.mubr.bf16.gmra.mrb[4].mxu0 %v3547_v17 }
  0x85   :  { %2758 = vmatprep.mubr.bf16.mxu0 %v3549_v18  ;;  %2803 = vmatpush3.bf16.msra.mxu0 %v3102_v26 }
  0x86   :  { %2804 = vmatprep.subr.bf16.mxu0 %v3103_v27 }
  0x89   :  { %2805 = vmatpush3.bf16.msra.mxu0 %v3103_v27 }
  0x8a   :  { %2806 = vmatprep.subr.bf16.mxu0 %v3104_v28 }
  0x8c   :  { %2759 = vmatmul.mubr.bf16.gmra.mrb[8].mxu0 %v3553_v19 }
  0x8d   :  { %2762 = vmatprep.mubr.bf16.mxu0 %v3555_v20  ;;  %2807 = vmatpush3.bf16.msra.mxu0 %v3104_v28 }
  0x8e   :  { %2808 = vmatprep.subr.bf16.mxu0 %v3105_v29 }
  0x91   :  { %2809 = vmatpush3.bf16.msra.mxu0 %v3105_v29 }
  0x92   :  { %2810 = vmatprep.subr.bf16.mxu0 %v3106_v12 }
  0x94   :  { %2763 = vmatmul.mubr.bf16.gmra.mrb[12].mxu0 %v3559_v21 }
  0x95   :  { %2811 = vmatpush3.bf16.msra.mxu0 %v3106_v12 }
 0x14f   :  { %v2752_v32 = vpop.f32.mrb[0].mxu0 }
 0x150   :  { %v344_v35 = vpop.f32.mrb[1].mxu0  ;;  %v353_v37 = vadd.f32 %v2752_v32, %v199_v30  ;;  %v3107_v32 = vld [vmem:[#allocation7 + $0x78] sm:$0xff]  }
 0x151   :  { %v2753_v36 = vpop.f32.mrb[2].mxu0  ;;  %v345_v40 = vadd.f32 %v344_v35, %v197_v33  ;;  %2812 = vmatprep.subr.bf16.mxu0 %v3107_v32  ;;  %v3579_v33 = vshrl.u32 %v431_v10, 7  ;;  %v3584_v35 = vld [vmem:[#allocation8] sm:$0xff] }
 0x152   :  { %v356_v38 = vadd.f32 %v2753_v36, %v200_v31  ;;  %v347_v39 = vpop.f32.mrb[3].mxu0  ;;  %2813 = vmatpush3.bf16.msra.mxu0 %v3107_v32 }
 0x153   :  { %v348_v41 = vadd.f32 %v347_v39, %v198_v34  ;;  %v3582_v34 = vsub.s32 0, %v3579_v33 }
 0x154   :  { %v408_v42 = vpack.c.bf16 %v356_v38, %v353_v37 }
 0x155   :  { %v407_v43 = vpack.c.bf16 %v348_v41, %v345_v40  ;;  %v434_v36 = vrot.slane %v3584_v35, %v3582_v34 }
 0x157   :  { %v2756_v46 = vpop.f32.mrb[4].mxu0  ;;  %2782 = vmatprep.mubr.bf16.mxu1 %v407_v43 }
 0x158   :  { %v360_v49 = vpop.f32.mrb[5].mxu0  ;;  %2783 = vmatmul.mubr.bf16.vlgmr.msra.gmra.mrb[0].mxu1 %v408_v42  ;;  %v369_v51 = vadd.f32 %v2756_v46, %v203_v44 }
 0x159   :  { %v2757_v50 = vpop.f32.mrb[6].mxu0  ;;  %v361_v54 = vadd.f32 %v360_v49, %v201_v47 }
 0x15a   :  { %v372_v52 = vadd.f32 %v2757_v50, %v204_v45  ;;  %v363_v53 = vpop.f32.mrb[7].mxu0 }
 0x15b   :  { %v364_v55 = vadd.f32 %v363_v53, %v202_v48 }
 0x15c   :  { %v410_v56 = vpack.c.bf16 %v372_v52, %v369_v51 }
 0x15d   :  { %v409_v57 = vpack.c.bf16 %v364_v55, %v361_v54 }
 0x15f   :  { %v2760_v60 = vpop.f32.mrb[8].mxu0  ;;  %2786 = vmatprep.mubr.bf16.mxu1 %v409_v57 }
 0x160   :  { %v376_v63 = vpop.f32.mrb[9].mxu0  ;;  %2787 = vmatmul.mubr.bf16.gmra.mrb[4].mxu1 %v410_v56  ;;  %v385_v1 = vadd.f32 %v2760_v60, %v207_v58 }
 0x161   :  { %v2761_v0 = vpop.f32.mrb[10].mxu0  ;;  %v377_v6 = vadd.f32 %v376_v63, %v205_v61 }
 0x162   :  { %v388_v2 = vadd.f32 %v2761_v0, %v208_v59  ;;  %v379_v4 = vpop.f32.mrb[11].mxu0 }
 0x163   :  { %v380_v7 = vadd.f32 %v379_v4, %v206_v62 }
 0x164   :  { %v412_v9 = vpack.c.bf16 %v388_v2, %v385_v1 }
 0x165   :  { %v411_v11 = vpack.c.bf16 %v380_v7, %v377_v6 }
 0x167   :  { %v2764_v14 = vpop.f32.mrb[12].mxu0  ;;  %2790 = vmatprep.mubr.bf16.mxu1 %v411_v11 }
 0x168   :  { %v392_v23 = vpop.f32.mrb[13].mxu0  ;;  %2791 = vmatmul.mubr.bf16.gmra.mrb[8].mxu1 %v412_v9  ;;  %v401_v25 = vadd.f32 %v2764_v14, %v211_v13 }
 0x169   :  { %v2765_v24 = vpop.f32.mrb[14].mxu0  ;;  %v393_v28 = vadd.f32 %v392_v23, %v209_v22 }
 0x16a   :  { %v404_v26 = vadd.f32 %v2765_v24, %v212_v8  ;;  %v395_v27 = vpop.f32.mrb[15].mxu0 }
 0x16b   :  { %v396_v29 = vadd.f32 %v395_v27, %v210_v5 }
 0x16c   :  { %v414_v30 = vpack.c.bf16 %v404_v26, %v401_v25 }
 0x16d   :  { %v413_v31 = vpack.c.bf16 %v396_v29, %v393_v28 }
 0x16f   :  { %2794 = vmatprep.mubr.bf16.mxu1 %v413_v31 }
 0x170   :  { %2795 = vmatmul.mubr.bf16.gmra.mrb[12].mxu1 %v414_v30 }
 0x171   :  { %2846 = vmatprep.mubr.bf16.mxu1 %v3513_v3 }
 0x22b   :  { %v2784_v37 = vpop.f32.mrb[0].mxu1 }
 0x22c   :  { %v526_v38 = vadd.f32 %v2784_v37, %v434_v36  ;;  %v517_v3 = vpop.f32.mrb[1].mxu1 }
 0x22d   :  { %v518_v39 = vadd.f32 %v517_v3, %v434_v36  ;;  %v2785_v40 = vpop.f32.mrb[2].mxu1 }
 0x22e   :  { %v529_v41 = vadd.f32 %v2785_v40, %v434_v36  ;;  %v520_v42 = vpop.f32.mrb[3].mxu1  ;;  %v582_v44 = vmax.f32 %v526_v38, 0.0 }
 0x22f   :  { %v521_v43 = vadd.f32 %v520_v42, %v434_v36  ;;  %v580_v46 = vmax.f32 %v518_v39, 0.0  ;;  %v3589_v39 = vsub.s32 1, %v3579_v33 }
 0x230   :  { %v583_v45 = vmax.f32 %v529_v41, 0.0 }
 0x231   :  { %v581_v47 = vmax.f32 %v521_v43, 0.0  ;;  %v3593_v40 = vrot.slane %v3584_v35, %v3589_v39 }
 0x232   :  { %v597_v48 = vpack.c.bf16 %v583_v45, %v582_v44 }
 0x233   :  { %v596_v49 = vpack.c.bf16 %v581_v47, %v580_v46  ;;  %v2788_v50 = vpop.f32.mrb[4].mxu1 }
 0x234   :  { %v542_v51 = vadd.f32 %v2788_v50, %v434_v36  ;;  %v533_v52 = vpop.f32.mrb[5].mxu1 }
 0x235   :  { %v534_v53 = vadd.f32 %v533_v52, %v434_v36  ;;  %v2789_v54 = vpop.f32.mrb[6].mxu1  ;;  %2814 = vmatprep.mubr.bf16.mxu0 %v596_v49 }
 0x236   :  { %v545_v55 = vadd.f32 %v2789_v54, %v434_v36  ;;  %v536_v56 = vpop.f32.mrb[7].mxu1  ;;  %2815 = vmatmul.mubr.bf16.vlgmr.msra.gmra.mrb[16].mxu0 %v597_v48  ;;  %v586_v58 = vmax.f32 %v542_v51, 0.0 }
 0x237   :  { %v537_v57 = vadd.f32 %v536_v56, %v434_v36  ;;  %v584_v60 = vmax.f32 %v534_v53, 0.0 }
 0x238   :  { %v587_v59 = vmax.f32 %v545_v55, 0.0 }
 0x239   :  { %v585_v61 = vmax.f32 %v537_v57, 0.0 }
 0x23a   :  { %v599_v62 = vpack.c.bf16 %v587_v59, %v586_v58 }
 0x23b   :  { %v598_v63 = vpack.c.bf16 %v585_v61, %v584_v60  ;;  %v2792_v0 = vpop.f32.mrb[8].mxu1 }
 0x23c   :  { %v558_v1 = vadd.f32 %v2792_v0, %v434_v36  ;;  %v549_v2 = vpop.f32.mrb[9].mxu1 }
 0x23d   :  { %v550_v4 = vadd.f32 %v549_v2, %v434_v36  ;;  %v2793_v6 = vpop.f32.mrb[10].mxu1  ;;  %2818 = vmatprep.mubr.bf16.mxu0 %v598_v63 }
 0x23e   :  { %v561_v7 = vadd.f32 %v2793_v6, %v434_v36  ;;  %v552_v9 = vpop.f32.mrb[11].mxu1  ;;  %2819 = vmatmul.mubr.bf16.gmra.mrb[20].mxu0 %v599_v62  ;;  %v590_v13 = vmax.f32 %v558_v1, 0.0 }
 0x23f   :  { %v553_v11 = vadd.f32 %v552_v9, %v434_v36  ;;  %v588_v14 = vmax.f32 %v550_v4, 0.0 }
 0x240   :  { %v591_v8 = vmax.f32 %v561_v7, 0.0 }
 0x241   :  { %v589_v22 = vmax.f32 %v553_v11, 0.0 }
 0x242   :  { %v601_v5 = vpack.c.bf16 %v591_v8, %v590_v13 }
 0x243   :  { %v600_v23 = vpack.c.bf16 %v589_v22, %v588_v14  ;;  %v2796_v24 = vpop.f32.mrb[12].mxu1  ;;  %v3108_v14 = vld [vmem:[#allocation7 + $0x80] sm:$0xff]   ;;  %v3109_v22 = vld [vmem:[#allocation7 + $0x88] sm:$0xff]  }
 0x244   :  { %v574_v25 = vadd.f32 %v2796_v24, %v434_v36  ;;  %v565_v26 = vpop.f32.mrb[13].mxu1  ;;  %2862 = vmatprep.subr.bf16.mxu0 %v3108_v14 }
 0x245   :  { %v566_v27 = vadd.f32 %v565_v26, %v434_v36  ;;  %v2797_v28 = vpop.f32.mrb[14].mxu1  ;;  %2822 = vmatprep.mubr.bf16.mxu0 %v600_v23  ;;  %2863 = vmatpush3.bf16.msra.mxu0 %v3108_v14 }
 0x246   :  { %v577_v29 = vadd.f32 %v2797_v28, %v434_v36  ;;  %v568_v30 = vpop.f32.mrb[15].mxu1  ;;  %2823 = vmatmul.mubr.bf16.gmra.mrb[24].mxu0 %v601_v5  ;;  %v594_v12 = vmax.f32 %v574_v25, 0.0  ;;  %2864 = vmatprep.subr.bf16.mxu0 %v3109_v22 }
 0x247   :  { %v569_v31 = vadd.f32 %v568_v30, %v434_v36  ;;  %v592_v10 = vmax.f32 %v566_v27, 0.0 }
 0x248   :  { %v595_v32 = vmax.f32 %v577_v29, 0.0 }
 0x249   :  { %v593_v37 = vmax.f32 %v569_v31, 0.0  ;;  %2865 = vmatpush3.bf16.msra.mxu0 %v3109_v22 }
 0x24a   :  { %v603_v38 = vpack.c.bf16 %v595_v32, %v594_v12 }
 0x24b   :  { %v602_v3 = vpack.c.bf16 %v593_v37, %v592_v10 }
 0x24d   :  { %2826 = vmatprep.mubr.bf16.mxu0 %v602_v3 }
 0x24e   :  { %2827 = vmatmul.mubr.bf16.gmra.mrb[28].mxu0 %v603_v38  ;;  %v3110_v38 = vld [vmem:[#allocation7 + $0x90] sm:$0xff]  }
 0x24f   :  { %2866 = vmatprep.subr.bf16.mxu0 %v3110_v38 }
 0x250   :  { %2867 = vmatpush3.bf16.msra.mxu0 %v3110_v38 }
 0x309   :  { %v2816_v41 = vpop.f32.mrb[16].mxu0 }
 0x30a   :  { %v3596_v42 = vadd.f32 %v2816_v41, %v3593_v40  ;;  %v707_v36 = vpop.f32.mrb[17].mxu0 }
 0x30b   :  { %v3599_v43 = vadd.f32 %v707_v36, %v3593_v40  ;;  %v2817_v44 = vpop.f32.mrb[18].mxu0 }
 0x30c   :  { %v710_v45 = vpop.f32.mrb[19].mxu0  ;;  %v772_v46 = vmul.f32 0.0, %v3596_v42  ;;  %v3603_v47 = vadd.f32 %v2817_v44, %v3593_v40 }
 0x30d   :  { %v3606_v48 = vadd.f32 %v710_v45, %v3593_v40  ;;  %v808_v49 = vmul.f32 %v3599_v43, %v3599_v43 }
 0x30e   :  { %v810_v52 = vmul.f32 %v772_v46, %v772_v46  ;;  %v773_v53 = vmul.f32 0.0, %v3603_v47 }
 0x30f   :  { %v786_v50 = vadd.f32 %v3606_v48, %v3599_v43  ;;  %v809_v51 = vmul.f32 %v3606_v48, %v3606_v48 }
 0x310   :  { %v811_v0 = vmul.f32 %v773_v53, %v773_v53 }
 0x311   :  { %v787_v54 = vadd.f32 %v786_v50, %v772_v46  ;;  %v824_v55 = vadd.f32 %v809_v51, %v808_v49  ;;  %v2820_v56 = vpop.f32.mrb[20].mxu0 }
 0x312   :  { %v3616_v57 = vadd.f32 %v2820_v56, %v3593_v40  ;;  %v723_v58 = vpop.f32.mrb[21].mxu0 }
 0x313   :  { %v825_v59 = vadd.f32 %v824_v55, %v810_v52  ;;  %v3619_v60 = vadd.f32 %v723_v58, %v3593_v40  ;;  %v2821_v61 = vpop.f32.mrb[22].mxu0  ;;  %v788_v2 = vadd.f32 %v787_v54, %v773_v53  ;;  %v3111_v53 = vld [vmem:[#allocation7 + $0x98] sm:$0xff]  }
 0x314   :  { %v3622_v62 = vadd.f32 %v2821_v61, %v3593_v40  ;;  %v726_v63 = vpop.f32.mrb[23].mxu0  ;;  %v776_v6 = vmul.f32 0.0, %v3616_v57  ;;  %2868 = vmatprep.subr.bf16.mxu0 %v3111_v53 }
 0x315   :  { %v774_v1 = vmul.f32 0.0, %v3619_v60  ;;  %v3626_v4 = vadd.f32 %v726_v63, %v3593_v40  ;;  %v826_v11 = vadd.f32 %v825_v59, %v811_v0  ;;  %2869 = vmatpush3.bf16.msra.mxu0 %v3111_v53 }
 0x316   :  { %v777_v8 = vmul.f32 0.0, %v3622_v62  ;;  %v814_v28 = vmul.f32 %v776_v6, %v776_v6 }
 0x317   :  { %v789_v7 = vadd.f32 %v788_v2, %v774_v1  ;;  %v812_v9 = vmul.f32 %v774_v1, %v774_v1  ;;  %v775_v13 = vmul.f32 0.0, %v3626_v4 }
 0x318   :  { %v815_v32 = vmul.f32 %v777_v8, %v777_v8 }
 0x319   :  { %v827_v5 = vadd.f32 %v826_v11, %v812_v9  ;;  %v790_v23 = vadd.f32 %v789_v7, %v775_v13  ;;  %v813_v24 = vmul.f32 %v775_v13, %v775_v13  ;;  %v2824_v25 = vpop.f32.mrb[24].mxu0  ;;  %v3112_v13 = vld [vmem:[#allocation7 + $0xa0] sm:$0xff]  }
 0x31a   :  { %v3632_v26 = vadd.f32 %v2824_v25, %v3593_v40  ;;  %v739_v27 = vpop.f32.mrb[25].mxu0  ;;  %2870 = vmatprep.subr.bf16.mxu0 %v3112_v13 }
 0x31b   :  { %v791_v29 = vadd.f32 %v790_v23, %v776_v6  ;;  %v828_v30 = vadd.f32 %v827_v5, %v813_v24  ;;  %v3635_v31 = vadd.f32 %v739_v27, %v3593_v40  ;;  %v2825_v12 = vpop.f32.mrb[26].mxu0  ;;  %2871 = vmatpush3.bf16.msra.mxu0 %v3112_v13 }
 0x31c   :  { %v3638_v10 = vadd.f32 %v2825_v12, %v3593_v40  ;;  %v742_v37 = vpop.f32.mrb[27].mxu0  ;;  %v780_v45 = vmul.f32 0.0, %v3632_v26 }
 0x31d   :  { %v829_v3 = vadd.f32 %v828_v30, %v814_v28  ;;  %v778_v41 = vmul.f32 0.0, %v3635_v31  ;;  %v792_v36 = vadd.f32 %v791_v29, %v777_v8  ;;  %v3642_v44 = vadd.f32 %v742_v37, %v3593_v40  ;;  %v3113_v29 = vld [vmem:[#allocation7 + $0xa8] sm:$0xff]  }
 0x31e   :  { %v781_v52 = vmul.f32 0.0, %v3638_v10  ;;  %v818_v63 = vmul.f32 %v780_v45, %v780_v45  ;;  %2872 = vmatprep.subr.bf16.mxu0 %v3113_v29 }
 0x31f   :  { %v793_v46 = vadd.f32 %v792_v36, %v778_v41  ;;  %v816_v49 = vmul.f32 %v778_v41, %v778_v41  ;;  %v830_v50 = vadd.f32 %v829_v3, %v815_v32  ;;  %v779_v51 = vmul.f32 0.0, %v3642_v44  ;;  %2873 = vmatpush3.bf16.msra.mxu0 %v3113_v29 }
 0x320   :  { %v819_v7 = vmul.f32 %v781_v52, %v781_v52  ;;  %v3666_v29 = vsub.s32 3, %v3579_v33 }
 0x321   :  { %v831_v54 = vadd.f32 %v830_v50, %v816_v49  ;;  %v794_v55 = vadd.f32 %v793_v46, %v779_v51  ;;  %v817_v56 = vmul.f32 %v779_v51, %v779_v51  ;;  %v2828_v58 = vpop.f32.mrb[28].mxu0 }
 0x322   :  { %v3648_v59 = vadd.f32 %v2828_v58, %v3593_v40  ;;  %v755_v61 = vpop.f32.mrb[29].mxu0 }
 0x323   :  { %v795_v0 = vadd.f32 %v794_v55, %v780_v45  ;;  %v832_v1 = vadd.f32 %v831_v54, %v817_v56  ;;  %v3651_v2 = vadd.f32 %v755_v61, %v3593_v40  ;;  %v2829_v6 = vpop.f32.mrb[30].mxu0 }
 0x324   :  { %v3654_v9 = vadd.f32 %v2829_v6, %v3593_v40  ;;  %v758_v11 = vpop.f32.mrb[31].mxu0  ;;  %v784_v23 = vmul.f32 0.0, %v3648_v59 }
 0x325   :  { %v833_v8 = vadd.f32 %v832_v1, %v818_v63  ;;  %v782_v14 = vmul.f32 0.0, %v3651_v2  ;;  %v796_v22 = vadd.f32 %v795_v0, %v781_v52  ;;  %v759_v5 = vadd.f32 %v758_v11, %v3593_v40 }
 0x326   :  { %v785_v12 = vmul.f32 0.0, %v3654_v9  ;;  %v822_v38 = vmul.f32 %v784_v23, %v784_v23 }
 0x327   :  { %v797_v24 = vadd.f32 %v796_v22, %v782_v14  ;;  %v820_v25 = vmul.f32 %v782_v14, %v782_v14  ;;  %v834_v27 = vadd.f32 %v833_v8, %v819_v7  ;;  %v783_v28 = vmul.f32 0.0, %v759_v5 }
 0x328   :  { %v823_v40 = vmul.f32 %v785_v12, %v785_v12  ;;  %v3661_v14 = vsub.s32 2, %v3579_v33 }
 0x329   :  { %v835_v30 = vadd.f32 %v834_v27, %v820_v25  ;;  %v798_v32 = vadd.f32 %v797_v24, %v783_v28  ;;  %v821_v37 = vmul.f32 %v783_v28, %v783_v28 }
 0x32b   :  { %v799_v3 = vadd.f32 %v798_v32, %v784_v23  ;;  %v836_v41 = vadd.f32 %v835_v30, %v821_v37 }
 0x32d   :  { %v800_v36 = vadd.f32 %v799_v3, %v785_v12  ;;  %v837_v45 = vadd.f32 %v836_v41, %v822_v38 }
 0x32f   :  { %v801_v46 = vrot.slane %v800_v36, 4  ;;  %v838_v49 = vadd.f32 %v837_v45, %v823_v40 }
 0x331   :  { %v802_v50 = vadd.f32 %v801_v46, %v800_v36  ;;  %v839_v51 = vrot.slane %v838_v49, 4 }
 0x333   :  { %v803_v52 = vrot.slane %v802_v50, 2  ;;  %v840_v53 = vadd.f32 %v839_v51, %v838_v49 }
 0x335   :  { %v804_v54 = vadd.f32 %v803_v52, %v802_v50  ;;  %v841_v55 = vrot.slane %v840_v53, 2 }
 0x337   :  { %v805_v56 = vrot.slane %v804_v54, 1  ;;  %v842_v58 = vadd.f32 %v841_v55, %v840_v53 }
 0x339   :  { %v806_v61 = vadd.f32 %v805_v56, %v804_v54  ;;  %v843_v63 = vrot.slane %v842_v58, 1 }
 0x33b   :  { %v807_v0 = vmul.f32 0.0625, %v806_v61  ;;  %v844_v1 = vadd.f32 %v843_v63, %v842_v58 }
 0x33d   :  { %v845_v6 = vmul.f32 0.0625, %v844_v1  ;;  %v846_v7 = vmul.f32 %v807_v0, %v807_v0 }
 0x33f   :  { %v847_v11 = vsub.f32 %v845_v6, %v846_v7 }
 0x341   :  { %v848_v13 = vmax.f32 %v847_v11, 0.0 }
 0x343   :  { %v849_v8 = vadd.f32 1e-05, %v848_v13 }
 0x345   :  { %3156 = vrsqrt.f32 %v849_v8 }
 0x34f   :  { %v3157_v22 = vpop.eup %3156 }
 0x350   :  { %v851_v23 = vmul.f32 %v3157_v22, %v3584_v35 }
 0x352   :  { %v852_v24 = vmul.f32 %v851_v23, %v807_v0  ;;  %v860_v25 = vrot.slane %v851_v23, %v3661_v14 }
 0x354   :  { %v854_v27 = vrot.slane %v852_v24, 7  ;;  %v874_v28 = vmul.f32 %v860_v25, %v759_v5  ;;  %v861_v30 = vmul.f32 %v860_v25, %v3599_v43  ;;  %v865_v12 = vmul.f32 %v860_v25, %v3619_v60 }
 0x355   :  { %v866_v32 = vmul.f32 %v860_v25, %v3626_v4  ;;  %v862_v38 = vmul.f32 %v860_v25, %v3606_v48  ;;  %v868_v3 = vmul.f32 %v860_v25, %v3622_v62  ;;  %v869_v41 = vmul.f32 %v860_v25, %v3635_v31 }
 0x356   :  { %v856_v37 = vsub.f32 %v3584_v35, %v854_v27  ;;  %v870_v40 = vmul.f32 %v860_v25, %v3642_v44  ;;  %v871_v5 = vmul.f32 %v860_v25, %v3632_v26  ;;  %v872_v33 = vmul.f32 %v860_v25, %v3638_v10 }
 0x357   :  { %v873_v43 = vmul.f32 %v860_v25, %v3651_v2  ;;  %v863_v4 = vmul.f32 %v860_v25, %v3596_v42  ;;  %v875_v35 = vmul.f32 %v860_v25, %v3648_v59  ;;  %v876_v48 = vmul.f32 %v860_v25, %v3654_v9 }
 0x358   :  { %v880_v60 = vrot.slane %v856_v37, %v3666_v29  ;;  %v864_v62 = vmul.f32 %v860_v25, %v3603_v47  ;;  %v867_v31 = vmul.f32 %v860_v25, %v3616_v57 }
 0x35a   :  { %v3685_v36 = vadd.f32 %v880_v60, %v874_v28  ;;  %v3687_v44 = vadd.f32 %v880_v60, %v861_v30  ;;  %v3689_v26 = vadd.f32 %v880_v60, %v862_v38  ;;  %v3691_v10 = vadd.f32 %v880_v60, %v863_v4  ;;  %v3114_v38 = vld [vmem:[#allocation7 + $0xb0] sm:$0xff]  }
 0x35b   :  { %v3693_v2 = vadd.f32 %v880_v60, %v864_v62  ;;  %v3695_v45 = vadd.f32 %v880_v60, %v865_v12  ;;  %v3697_v42 = vadd.f32 %v880_v60, %v866_v32  ;;  %v3699_v59 = vadd.f32 %v880_v60, %v867_v31  ;;  %2874 = vmatprep.subr.bf16.mxu0 %v3114_v38 }
 0x35c   :  { %v897_v47 = vmax.f32 %v3687_v44, 0.0  ;;  %v898_v57 = vmax.f32 %v3689_v26, 0.0  ;;  %v899_v9 = vmax.f32 %v3691_v10, 0.0  ;;  %v3705_v49 = vadd.f32 %v880_v60, %v868_v3  ;;  %2875 = vmatpush3.bf16.msra.mxu0 %v3114_v38  ;;  %v3115_v3 = vld [vmem:[#allocation7 + $0xb8] sm:$0xff]  }
 0x35d   :  { %v900_v46 = vmax.f32 %v3693_v2, 0.0  ;;  %v3711_v51 = vadd.f32 %v880_v60, %v869_v41  ;;  %v3713_v52 = vadd.f32 %v880_v60, %v870_v40  ;;  %v901_v53 = vmax.f32 %v3695_v45, 0.0  ;;  %2876 = vmatprep.subr.bf16.mxu0 %v3115_v3  ;;  %v3116_v41 = vld [vmem:[#allocation7 + $0xc0] sm:$0xff]  }
 0x35e   :  { %v915_v50 = vpack.c.bf16 %v898_v57, %v897_v47  ;;  %v3716_v54 = vadd.f32 %v880_v60, %v871_v5  ;;  %v902_v56 = vmax.f32 %v3697_v42, 0.0  ;;  %v3723_v58 = vadd.f32 %v880_v60, %v872_v33 }
 0x35f   :  { %v916_v55 = vpack.c.bf16 %v900_v46, %v899_v9  ;;  %v3725_v61 = vadd.f32 %v880_v60, %v873_v43  ;;  %v3727_v63 = vadd.f32 %v880_v60, %v875_v35  ;;  %v3729_v0 = vadd.f32 %v880_v60, %v876_v48 }
 0x360   :  { %2830 = vmatprep.subr.bf16.mxu1 %v915_v50  ;;  %v917_v1 = vpack.c.bf16 %v902_v56, %v901_v53  ;;  %v903_v6 = vmax.f32 %v3699_v59, 0.0  ;;  %v904_v7 = vmax.f32 %v3705_v49, 0.0  ;;  %v905_v13 = vmax.f32 %v3711_v51, 0.0  ;;  %2877 = vmatpush3.bf16.msra.mxu0 %v3115_v3 }
 0x361   :  { %2831 = vmatpush3.bf16.msra.mxu1 %v915_v50  ;;  %v906_v8 = vmax.f32 %v3713_v52, 0.0  ;;  %v907_v23 = vmax.f32 %v3716_v54, 0.0  ;;  %v908_v24 = vmax.f32 %v3723_v58, 0.0  ;;  %v910_v25 = vmax.f32 %v3685_v36, 0.0 }
 0x362   :  { %2832 = vmatprep.subr.bf16.mxu1 %v916_v55  ;;  %v918_v11 = vpack.c.bf16 %v904_v7, %v903_v6  ;;  %v909_v28 = vmax.f32 %v3725_v61, 0.0  ;;  %v911_v12 = vmax.f32 %v3727_v63, 0.0  ;;  %v912_v32 = vmax.f32 %v3729_v0, 0.0  ;;  %v3804_v63 = vld [vmem:[#allocation8 + $0x8] sm:$0xff] }
 0x363   :  { %v919_v22 = vpack.c.bf16 %v906_v8, %v905_v13  ;;  %v920_v27 = vpack.c.bf16 %v908_v24, %v907_v23  ;;  %v1048_v61 = vrot.slane %v3804_v63, %v3582_v34 }
 0x364   :  { %v921_v30 = vpack.c.bf16 %v910_v25, %v909_v28  ;;  %v922_v37 = vpack.c.bf16 %v912_v32, %v911_v12 }
 0x365   :  { %2833 = vmatpush3.bf16.msra.mxu1 %v916_v55 }
 0x366   :  { %2834 = vmatprep.subr.bf16.mxu1 %v917_v1 }
 0x369   :  { %2835 = vmatpush3.bf16.msra.mxu1 %v917_v1 }
 0x36a   :  { %2836 = vmatprep.subr.bf16.mxu1 %v918_v11 }
 0x36d   :  { %2837 = vmatpush3.bf16.msra.mxu1 %v918_v11 }
 0x36e   :  { %2838 = vmatprep.subr.bf16.mxu1 %v919_v22 }
 0x371   :  { %2839 = vmatpush3.bf16.msra.mxu1 %v919_v22 }
 0x372   :  { %2840 = vmatprep.subr.bf16.mxu1 %v920_v27 }
 0x375   :  { %2841 = vmatpush3.bf16.msra.mxu1 %v920_v27  ;;  %v3122_v27 = vld [vmem:[#allocation7 + $0xf0] sm:$0xff]  }
 0x376   :  { %2842 = vmatprep.subr.bf16.mxu1 %v921_v30 }
 0x379   :  { %2843 = vmatpush3.bf16.msra.mxu1 %v921_v30  ;;  %v3123_v30 = vld [vmem:[#allocation7 + $0xf8] sm:$0xff]  }
 0x37a   :  { %2844 = vmatprep.subr.bf16.mxu1 %v922_v37 }
 0x37d   :  { %2845 = vmatpush3.bf16.msra.mxu1 %v922_v37 }
 0x37e   :  { %2894 = vmatprep.subr.bf16.mxu1 %v3116_v41 }
 0x380   :  { %2847 = vmatmul.mubr.bf16.vlgmr.msra.gmra.mrb[16].mxu1 %v3540_v15  ;;  %v3117_v15 = vld [vmem:[#allocation7 + $0xc8] sm:$0xff]  }
 0x381   :  { %2850 = vmatprep.mubr.bf16.mxu1 %v3542_v16  ;;  %2895 = vmatpush3.bf16.msra.mxu1 %v3116_v41  ;;  %v3118_v16 = vld [vmem:[#allocation7 + $0xd0] sm:$0xff]  }
 0x382   :  { %2896 = vmatprep.subr.bf16.mxu1 %v3117_v15 }
 0x385   :  { %2897 = vmatpush3.bf16.msra.mxu1 %v3117_v15 }
 0x386   :  { %2898 = vmatprep.subr.bf16.mxu1 %v3118_v16 }
 0x388   :  { %2851 = vmatmul.mubr.bf16.gmra.mrb[20].mxu1 %v3547_v17  ;;  %v3119_v17 = vld [vmem:[#allocation7 + $0xd8] sm:$0xff]  }
 0x389   :  { %2854 = vmatprep.mubr.bf16.mxu1 %v3549_v18  ;;  %2899 = vmatpush3.bf16.msra.mxu1 %v3118_v16  ;;  %v3120_v18 = vld [vmem:[#allocation7 + $0xe0] sm:$0xff]  }
 0x38a   :  { %2900 = vmatprep.subr.bf16.mxu1 %v3119_v17 }
 0x38d   :  { %2901 = vmatpush3.bf16.msra.mxu1 %v3119_v17 }
 0x38e   :  { %2902 = vmatprep.subr.bf16.mxu1 %v3120_v18 }
 0x390   :  { %2855 = vmatmul.mubr.bf16.gmra.mrb[24].mxu1 %v3553_v19  ;;  %v3121_v19 = vld [vmem:[#allocation7 + $0xe8] sm:$0xff]  }
 0x391   :  { %2858 = vmatprep.mubr.bf16.mxu1 %v3555_v20  ;;  %2903 = vmatpush3.bf16.msra.mxu1 %v3120_v18 }
 0x392   :  { %2904 = vmatprep.subr.bf16.mxu1 %v3121_v19 }
 0x395   :  { %2905 = vmatpush3.bf16.msra.mxu1 %v3121_v19 }
 0x396   :  { %2906 = vmatprep.subr.bf16.mxu1 %v3122_v27 }
 0x398   :  { %2859 = vmatmul.mubr.bf16.gmra.mrb[28].mxu1 %v3559_v21 }
 0x399   :  { %2907 = vmatpush3.bf16.msra.mxu1 %v3122_v27  ;;  %v3810_v27 = vrot.slane %v3804_v63, %v3589_v39 }
 0x39a   :  { %2908 = vmatprep.subr.bf16.mxu1 %v3123_v30 }
 0x39d   :  { %2909 = vmatpush3.bf16.msra.mxu1 %v3123_v30 }
 0x453   :  { %v2848_v20 = vpop.f32.mrb[16].mxu1 }
 0x454   :  { %v957_v21 = vpop.f32.mrb[17].mxu1  ;;  %v966_v5 = vadd.f32 %v2848_v20, %v899_v9 }
 0x455   :  { %v2849_v40 = vpop.f32.mrb[18].mxu1  ;;  %v958_v60 = vadd.f32 %v957_v21, %v897_v47 }
 0x456   :  { %v969_v33 = vadd.f32 %v2849_v40, %v900_v46  ;;  %v960_v43 = vpop.f32.mrb[19].mxu1 }
 0x457   :  { %v961_v4 = vadd.f32 %v960_v43, %v898_v57 }
 0x458   :  { %v1021_v35 = vpack.c.bf16 %v969_v33, %v966_v5 }
 0x459   :  { %v1020_v48 = vpack.c.bf16 %v961_v4, %v958_v60 }
 0x45b   :  { %v2852_v62 = vpop.f32.mrb[20].mxu1  ;;  %2878 = vmatprep.mubr.bf16.mxu0 %v1020_v48 }
 0x45c   :  { %v973_v31 = vpop.f32.mrb[21].mxu1  ;;  %2879 = vmatmul.mubr.bf16.vlgmr.msra.gmra.mrb[32].mxu0 %v1021_v35  ;;  %v982_v10 = vadd.f32 %v2852_v62, %v903_v6 }
 0x45d   :  { %v2853_v50 = vpop.f32.mrb[22].mxu1  ;;  %v974_v44 = vadd.f32 %v973_v31, %v901_v53 }
 0x45e   :  { %v985_v2 = vadd.f32 %v2853_v50, %v904_v7  ;;  %v976_v9 = vpop.f32.mrb[23].mxu1 }
 0x45f   :  { %v977_v26 = vadd.f32 %v976_v9, %v902_v56 }
 0x460   :  { %v1023_v47 = vpack.c.bf16 %v985_v2, %v982_v10 }
 0x461   :  { %v1022_v57 = vpack.c.bf16 %v977_v26, %v974_v44 }
 0x463   :  { %v2856_v46 = vpop.f32.mrb[24].mxu1  ;;  %2882 = vmatprep.mubr.bf16.mxu0 %v1022_v57 }
 0x464   :  { %v989_v55 = vpop.f32.mrb[25].mxu1  ;;  %2883 = vmatmul.mubr.bf16.gmra.mrb[36].mxu0 %v1023_v47  ;;  %v998_v59 = vadd.f32 %v2856_v46, %v907_v23 }
 0x465   :  { %v2857_v1 = vpop.f32.mrb[26].mxu1  ;;  %v990_v45 = vadd.f32 %v989_v55, %v905_v13 }
 0x466   :  { %v1001_v49 = vadd.f32 %v2857_v1, %v908_v24  ;;  %v992_v6 = vpop.f32.mrb[27].mxu1  ;;  %v3162_v24 = vld [vmem:[#allocation2] sm:$0xff]  }
 0x467   :  { %v993_v42 = vadd.f32 %v992_v6, %v906_v8 }
 0x468   :  { %v1025_v53 = vpack.c.bf16 %v1001_v49, %v998_v59 }
 0x469   :  { %v1024_v56 = vpack.c.bf16 %v993_v42, %v990_v45 }
 0x46b   :  { %v2860_v7 = vpop.f32.mrb[28].mxu1  ;;  %2886 = vmatprep.mubr.bf16.mxu0 %v1024_v56 }
 0x46c   :  { %v1005_v11 = vpop.f32.mrb[29].mxu1  ;;  %2887 = vmatmul.mubr.bf16.gmra.mrb[40].mxu0 %v1025_v53  ;;  %v1014_v54 = vadd.f32 %v2860_v7, %v911_v12 }
 0x46d   :  { %v2861_v22 = vpop.f32.mrb[30].mxu1  ;;  %v1006_v51 = vadd.f32 %v1005_v11, %v909_v28 }
 0x46e   :  { %v1017_v58 = vadd.f32 %v2861_v22, %v912_v32  ;;  %v1008_v23 = vpop.f32.mrb[31].mxu1 }
 0x46f   :  { %v1009_v52 = vadd.f32 %v1008_v23, %v910_v25 }
 0x470   :  { %v1027_v13 = vpack.c.bf16 %v1017_v58, %v1014_v54 }
 0x471   :  { %v1026_v8 = vpack.c.bf16 %v1009_v52, %v1006_v51 }
 0x473   :  { %2890 = vmatprep.mubr.bf16.mxu0 %v1026_v8 }
 0x474   :  { %2891 = vmatmul.mubr.bf16.gmra.mrb[44].mxu0 %v1027_v13 }
 0x475   :  { %2942 = vmatprep.mubr.bf16.mxu0 %v3162_v24 }
 0x52f   :  { %v2880_v0 = vpop.f32.mrb[32].mxu0 }
 0x530   :  { %v1140_v36 = vadd.f32 %v2880_v0, %v1048_v61  ;;  %v1131_v25 = vpop.f32.mrb[33].mxu0 }
 0x531   :  { %v1132_v28 = vadd.f32 %v1131_v25, %v1048_v61  ;;  %v2881_v12 = vpop.f32.mrb[34].mxu0 }
 0x532   :  { %v1143_v32 = vadd.f32 %v2881_v12, %v1048_v61  ;;  %v1134_v37 = vpop.f32.mrb[35].mxu0  ;;  %v1196_v3 = vmax.f32 %v1140_v36, 0.0 }
 0x533   :  { %v1135_v38 = vadd.f32 %v1134_v37, %v1048_v61  ;;  %v1194_v15 = vmax.f32 %v1132_v28, 0.0 }
 0x534   :  { %v1197_v41 = vmax.f32 %v1143_v32, 0.0 }
 0x535   :  { %v1195_v16 = vmax.f32 %v1135_v38, 0.0 }
 0x536   :  { %v1211_v17 = vpack.c.bf16 %v1197_v41, %v1196_v3 }
 0x537   :  { %v1210_v18 = vpack.c.bf16 %v1195_v16, %v1194_v15  ;;  %v2884_v19 = vpop.f32.mrb[36].mxu0 }
 0x538   :  { %v1156_v20 = vadd.f32 %v2884_v19, %v1048_v61  ;;  %v1147_v21 = vpop.f32.mrb[37].mxu0 }
 0x539   :  { %v1148_v40 = vadd.f32 %v1147_v21, %v1048_v61  ;;  %v2885_v5 = vpop.f32.mrb[38].mxu0  ;;  %2910 = vmatprep.mubr.bf16.mxu1 %v1210_v18 }
 0x53a   :  { %v1159_v33 = vadd.f32 %v2885_v5, %v1048_v61  ;;  %v1150_v43 = vpop.f32.mrb[39].mxu0  ;;  %2911 = vmatmul.mubr.bf16.vlgmr.msra.gmra.mrb[32].mxu1 %v1211_v17  ;;  %v1200_v4 = vmax.f32 %v1156_v20, 0.0 }
 0x53b   :  { %v1151_v60 = vadd.f32 %v1150_v43, %v1048_v61  ;;  %v1198_v48 = vmax.f32 %v1148_v40, 0.0 }
 0x53c   :  { %v1201_v35 = vmax.f32 %v1159_v33, 0.0 }
 0x53d   :  { %v1199_v62 = vmax.f32 %v1151_v60, 0.0 }
 0x53e   :  { %v1213_v31 = vpack.c.bf16 %v1201_v35, %v1200_v4 }
 0x53f   :  { %v1212_v50 = vpack.c.bf16 %v1199_v62, %v1198_v48  ;;  %v2888_v10 = vpop.f32.mrb[40].mxu0 }
 0x540   :  { %v1172_v2 = vadd.f32 %v2888_v10, %v1048_v61  ;;  %v1163_v9 = vpop.f32.mrb[41].mxu0 }
 0x541   :  { %v1164_v44 = vadd.f32 %v1163_v9, %v1048_v61  ;;  %v2889_v26 = vpop.f32.mrb[42].mxu0  ;;  %2914 = vmatprep.mubr.bf16.mxu1 %v1212_v50 }
 0x542   :  { %v1175_v47 = vadd.f32 %v2889_v26, %v1048_v61  ;;  %v1166_v57 = vpop.f32.mrb[43].mxu0  ;;  %2915 = vmatmul.mubr.bf16.gmra.mrb[36].mxu1 %v1213_v31  ;;  %v1204_v55 = vmax.f32 %v1172_v2, 0.0  ;;  %v3124_v26 = vld [vmem:[#allocation7 + $0x100] sm:$0xff]  }
 0x543   :  { %v1167_v46 = vadd.f32 %v1166_v57, %v1048_v61  ;;  %v1202_v59 = vmax.f32 %v1164_v44, 0.0  ;;  %2958 = vmatprep.subr.bf16.mxu1 %v3124_v26 }
 0x544   :  { %v1205_v1 = vmax.f32 %v1175_v47, 0.0  ;;  %v3125_v47 = vld [vmem:[#allocation7 + $0x108] sm:$0xff]   ;;  %2959 = vmatpush3.bf16.msra.mxu1 %v3124_v26 }
 0x545   :  { %v1203_v49 = vmax.f32 %v1167_v46, 0.0  ;;  %2960 = vmatprep.subr.bf16.mxu1 %v3125_v47 }
 0x546   :  { %v1215_v6 = vpack.c.bf16 %v1205_v1, %v1204_v55 }
 0x547   :  { %v1214_v45 = vpack.c.bf16 %v1203_v49, %v1202_v59  ;;  %v2892_v42 = vpop.f32.mrb[44].mxu0 }
 0x548   :  { %v1188_v53 = vadd.f32 %v2892_v42, %v1048_v61  ;;  %v1179_v56 = vpop.f32.mrb[45].mxu0  ;;  %2961 = vmatpush3.bf16.msra.mxu1 %v3125_v47 }
 0x549   :  { %v1180_v7 = vadd.f32 %v1179_v56, %v1048_v61  ;;  %v2893_v11 = vpop.f32.mrb[46].mxu0  ;;  %2918 = vmatprep.mubr.bf16.mxu1 %v1214_v45 }
 0x54a   :  { %v1191_v22 = vadd.f32 %v2893_v11, %v1048_v61  ;;  %v1182_v54 = vpop.f32.mrb[47].mxu0  ;;  %2919 = vmatmul.mubr.bf16.gmra.mrb[40].mxu1 %v1215_v6  ;;  %v1208_v23 = vmax.f32 %v1188_v53, 0.0 }
 0x54b   :  { %v1183_v58 = vadd.f32 %v1182_v54, %v1048_v61  ;;  %v1206_v52 = vmax.f32 %v1180_v7, 0.0  ;;  %v3126_v54 = vld [vmem:[#allocation7 + $0x110] sm:$0xff]  }
 0x54c   :  { %v1209_v51 = vmax.f32 %v1191_v22, 0.0  ;;  %2962 = vmatprep.subr.bf16.mxu1 %v3126_v54 }
 0x54d   :  { %v1207_v13 = vmax.f32 %v1183_v58, 0.0  ;;  %2963 = vmatpush3.bf16.msra.mxu1 %v3126_v54 }
 0x54e   :  { %v1217_v8 = vpack.c.bf16 %v1209_v51, %v1208_v23 }
 0x54f   :  { %v1216_v24 = vpack.c.bf16 %v1207_v13, %v1206_v52 }
 0x551   :  { %2922 = vmatprep.mubr.bf16.mxu1 %v1216_v24 }
 0x552   :  { %2923 = vmatmul.mubr.bf16.gmra.mrb[44].mxu1 %v1217_v8 }
 0x60d   :  { %v2912_v30 = vpop.f32.mrb[32].mxu1 }
 0x60e   :  { %v3813_v0 = vadd.f32 %v2912_v30, %v3810_v27  ;;  %v1321_v36 = vpop.f32.mrb[33].mxu1 }
 0x60f   :  { %v3816_v25 = vadd.f32 %v1321_v36, %v3810_v27  ;;  %v2913_v61 = vpop.f32.mrb[34].mxu1 }
 0x610   :  { %v1324_v28 = vpop.f32.mrb[35].mxu1  ;;  %v1386_v12 = vmul.f32 0.0, %v3813_v0  ;;  %v3820_v32 = vadd.f32 %v2913_v61, %v3810_v27 }
 0x611   :  { %v3823_v37 = vadd.f32 %v1324_v28, %v3810_v27  ;;  %v1422_v38 = vmul.f32 %v3816_v25, %v3816_v25  ;;  %v3127_v28 = vld [vmem:[#allocation7 + $0x118] sm:$0xff]  }
 0x612   :  { %v1424_v15 = vmul.f32 %v1386_v12, %v1386_v12  ;;  %v1387_v16 = vmul.f32 0.0, %v3820_v32  ;;  %2964 = vmatprep.subr.bf16.mxu1 %v3127_v28 }
 0x613   :  { %v1400_v3 = vadd.f32 %v3823_v37, %v3816_v25  ;;  %v1423_v41 = vmul.f32 %v3823_v37, %v3823_v37  ;;  %2965 = vmatpush3.bf16.msra.mxu1 %v3127_v28 }
 0x614   :  { %v1425_v4 = vmul.f32 %v1387_v16, %v1387_v16 }
 0x615   :  { %v1401_v17 = vadd.f32 %v1400_v3, %v1386_v12  ;;  %v1438_v18 = vadd.f32 %v1423_v41, %v1422_v38  ;;  %v2916_v19 = vpop.f32.mrb[36].mxu1 }
 0x616   :  { %v3833_v20 = vadd.f32 %v2916_v19, %v3810_v27  ;;  %v1337_v21 = vpop.f32.mrb[37].mxu1 }
 0x617   :  { %v1439_v40 = vadd.f32 %v1438_v18, %v1424_v15  ;;  %v3836_v5 = vadd.f32 %v1337_v21, %v3810_v27  ;;  %v2917_v33 = vpop.f32.mrb[38].mxu1  ;;  %v1402_v48 = vadd.f32 %v1401_v17, %v1387_v16 }
 0x618   :  { %v3839_v43 = vadd.f32 %v2917_v33, %v3810_v27  ;;  %v1340_v60 = vpop.f32.mrb[39].mxu1  ;;  %v1390_v31 = vmul.f32 0.0, %v3833_v20 }
 0x619   :  { %v1388_v35 = vmul.f32 0.0, %v3836_v5  ;;  %v3843_v62 = vadd.f32 %v1340_v60, %v3810_v27  ;;  %v1440_v2 = vadd.f32 %v1439_v40, %v1425_v4 }
 0x61a   :  { %v1391_v44 = vmul.f32 0.0, %v3839_v43  ;;  %v1428_v6 = vmul.f32 %v1390_v31, %v1390_v31 }
 0x61b   :  { %v1403_v50 = vadd.f32 %v1402_v48, %v1388_v35  ;;  %v1426_v10 = vmul.f32 %v1388_v35, %v1388_v35  ;;  %v1389_v9 = vmul.f32 0.0, %v3843_v62  ;;  %v3128_v35 = vld [vmem:[#allocation7 + $0x120] sm:$0xff]  }
 0x61c   :  { %v1429_v7 = vmul.f32 %v1391_v44, %v1391_v44  ;;  %2966 = vmatprep.subr.bf16.mxu1 %v3128_v35 }
 0x61d   :  { %v1441_v57 = vadd.f32 %v1440_v2, %v1426_v10  ;;  %v1404_v46 = vadd.f32 %v1403_v50, %v1389_v9  ;;  %v1427_v55 = vmul.f32 %v1389_v9, %v1389_v9  ;;  %v2920_v1 = vpop.f32.mrb[40].mxu1  ;;  %2967 = vmatpush3.bf16.msra.mxu1 %v3128_v35 }
 0x61e   :  { %v3849_v59 = vadd.f32 %v2920_v1, %v3810_v27  ;;  %v1353_v49 = vpop.f32.mrb[41].mxu1 }
 0x61f   :  { %v1405_v45 = vadd.f32 %v1404_v46, %v1390_v31  ;;  %v1442_v42 = vadd.f32 %v1441_v57, %v1427_v55  ;;  %v3852_v53 = vadd.f32 %v1353_v49, %v3810_v27  ;;  %v2921_v56 = vpop.f32.mrb[42].mxu1  ;;  %v3129_v57 = vld [vmem:[#allocation7 + $0x128] sm:$0xff]  }
 0x620   :  { %v3855_v11 = vadd.f32 %v2921_v56, %v3810_v27  ;;  %v1356_v22 = vpop.f32.mrb[43].mxu1  ;;  %v1394_v13 = vmul.f32 0.0, %v3849_v59  ;;  %2968 = vmatprep.subr.bf16.mxu1 %v3129_v57 }
 0x621   :  { %v1443_v58 = vadd.f32 %v1442_v42, %v1428_v6  ;;  %v1392_v23 = vmul.f32 0.0, %v3852_v53  ;;  %v1406_v51 = vadd.f32 %v1405_v45, %v1391_v44  ;;  %v3859_v52 = vadd.f32 %v1356_v22, %v3810_v27  ;;  %2969 = vmatpush3.bf16.msra.mxu1 %v3129_v57 }
 0x622   :  { %v1395_v61 = vmul.f32 0.0, %v3855_v11  ;;  %v1432_v17 = vmul.f32 %v1394_v13, %v1394_v13 }
 0x623   :  { %v1407_v8 = vadd.f32 %v1406_v51, %v1392_v23  ;;  %v1430_v24 = vmul.f32 %v1392_v23, %v1392_v23  ;;  %v1444_v30 = vadd.f32 %v1443_v58, %v1429_v7  ;;  %v1393_v36 = vmul.f32 0.0, %v3859_v52 }
 0x624   :  { %v1433_v33 = vmul.f32 %v1395_v61, %v1395_v61 }
 0x625   :  { %v1445_v12 = vadd.f32 %v1444_v30, %v1430_v24  ;;  %v1408_v38 = vadd.f32 %v1407_v8, %v1393_v36  ;;  %v1431_v3 = vmul.f32 %v1393_v36, %v1393_v36  ;;  %v2924_v41 = vpop.f32.mrb[44].mxu1 }
 0x626   :  { %v3865_v15 = vadd.f32 %v2924_v41, %v3810_v27  ;;  %v1369_v16 = vpop.f32.mrb[45].mxu1 }
 0x627   :  { %v1409_v18 = vadd.f32 %v1408_v38, %v1394_v13  ;;  %v1446_v19 = vadd.f32 %v1445_v12, %v1431_v3  ;;  %v3868_v21 = vadd.f32 %v1369_v16, %v3810_v27  ;;  %v2925_v40 = vpop.f32.mrb[46].mxu1 }
 0x628   :  { %v3871_v60 = vadd.f32 %v2925_v40, %v3810_v27  ;;  %v1372_v4 = vpop.f32.mrb[47].mxu1  ;;  %v1398_v2 = vmul.f32 0.0, %v3865_v15 }
 0x629   :  { %v1447_v48 = vadd.f32 %v1446_v19, %v1432_v17  ;;  %v1396_v31 = vmul.f32 0.0, %v3868_v21  ;;  %v1410_v50 = vadd.f32 %v1409_v18, %v1395_v61  ;;  %v1373_v10 = vadd.f32 %v1372_v4, %v3810_v27 }
 0x62a   :  { %v1399_v55 = vmul.f32 0.0, %v3871_v60  ;;  %v1436_v6 = vmul.f32 %v1398_v2, %v1398_v2 }
 0x62b   :  { %v1411_v9 = vadd.f32 %v1410_v50, %v1396_v31  ;;  %v1434_v44 = vmul.f32 %v1396_v31, %v1396_v31  ;;  %v1448_v26 = vadd.f32 %v1447_v48, %v1433_v33  ;;  %v1397_v47 = vmul.f32 0.0, %v1373_v10 }
 0x62c   :  { %v1437_v27 = vmul.f32 %v1399_v55, %v1399_v55 }
 0x62d   :  { %v1449_v46 = vadd.f32 %v1448_v26, %v1434_v44  ;;  %v1412_v1 = vadd.f32 %v1411_v9, %v1397_v47  ;;  %v1435_v49 = vmul.f32 %v1397_v47, %v1397_v47 }
 0x62f   :  { %v1413_v45 = vadd.f32 %v1412_v1, %v1398_v2  ;;  %v1450_v42 = vadd.f32 %v1449_v46, %v1435_v49 }
 0x631   :  { %v1414_v56 = vadd.f32 %v1413_v45, %v1399_v55  ;;  %v1451_v7 = vadd.f32 %v1450_v42, %v1436_v6 }
 0x633   :  { %v1415_v22 = vrot.slane %v1414_v56, 4  ;;  %v1452_v54 = vadd.f32 %v1451_v7, %v1437_v27 }
 0x635   :  { %v1416_v58 = vadd.f32 %v1415_v22, %v1414_v56  ;;  %v1453_v23 = vrot.slane %v1452_v54, 4 }
 0x637   :  { %v1417_v51 = vrot.slane %v1416_v58, 2  ;;  %v1454_v13 = vadd.f32 %v1453_v23, %v1452_v54 }
 0x639   :  { %v1418_v8 = vadd.f32 %v1417_v51, %v1416_v58  ;;  %v1455_v24 = vrot.slane %v1454_v13, 2 }
 0x63b   :  { %v1419_v30 = vrot.slane %v1418_v8, 1  ;;  %v1456_v36 = vadd.f32 %v1455_v24, %v1454_v13 }
 0x63d   :  { %v1420_v61 = vadd.f32 %v1419_v30, %v1418_v8  ;;  %v1457_v28 = vrot.slane %v1456_v36, 1 }
 0x63f   :  { %v1421_v12 = vmul.f32 0.0625, %v1420_v61  ;;  %v1458_v38 = vadd.f32 %v1457_v28, %v1456_v36 }
 0x641   :  { %v1459_v3 = vmul.f32 0.0625, %v1458_v38  ;;  %v1460_v41 = vmul.f32 %v1421_v12, %v1421_v12 }
 0x643   :  { %v1461_v16 = vsub.f32 %v1459_v3, %v1460_v41 }
 0x645   :  { %v1462_v17 = vmax.f32 %v1461_v16, 0.0 }
 0x647   :  { %v1463_v18 = vadd.f32 1e-05, %v1462_v17 }
 0x649   :  { %3158 = vrsqrt.f32 %v1463_v18 }
 0x653   :  { %v3159_v19 = vpop.eup %3158 }
 0x654   :  { %v1465_v40 = vmul.f32 %v3159_v19, %v3804_v63 }
 0x656   :  { %v1466_v33 = vmul.f32 %v1465_v40, %v1421_v12  ;;  %v1474_v4 = vrot.slane %v1465_v40, %v3661_v14 }
 0x658   :  { %v1468_v35 = vrot.slane %v1466_v33, 7  ;;  %v1488_v48 = vmul.f32 %v1474_v4, %v1373_v10  ;;  %v1475_v31 = vmul.f32 %v1474_v4, %v3816_v25  ;;  %v1479_v50 = vmul.f32 %v1474_v4, %v3836_v5 }
 0x659   :  { %v1480_v2 = vmul.f32 %v1474_v4, %v3843_v62  ;;  %v1476_v44 = vmul.f32 %v1474_v4, %v3823_v37  ;;  %v1482_v26 = vmul.f32 %v1474_v4, %v3839_v43  ;;  %v1483_v47 = vmul.f32 %v1474_v4, %v3852_v53 }
 0x65a   :  { %v1470_v9 = vsub.f32 %v3804_v63, %v1468_v35  ;;  %v1484_v57 = vmul.f32 %v1474_v4, %v3859_v52  ;;  %v1485_v46 = vmul.f32 %v1474_v4, %v3849_v59  ;;  %v1486_v10 = vmul.f32 %v1474_v4, %v3855_v11  ;;  %v3164_v35 = vld [vmem:[#allocation2 + $0x10] sm:$0xff]  }
 0x65b   :  { %v1487_v25 = vmul.f32 %v1474_v4, %v3868_v21  ;;  %v1477_v62 = vmul.f32 %v1474_v4, %v3813_v0  ;;  %v1489_v63 = vmul.f32 %v1474_v4, %v3865_v15  ;;  %v1490_v37 = vmul.f32 %v1474_v4, %v3871_v60 }
 0x65c   :  { %v1494_v5 = vrot.slane %v1470_v9, %v3666_v29  ;;  %v1478_v43 = vmul.f32 %v1474_v4, %v3820_v32  ;;  %v1481_v53 = vmul.f32 %v1474_v4, %v3833_v20  ;;  %v3163_v4 = vld [vmem:[#allocation2 + $0x8] sm:$0xff]   ;;  %v3169_v9 = vld [vmem:[#allocation2 + $0x38] sm:$0xff]  }
 0x65e   :  { %v3896_v55 = vadd.f32 %v1494_v5, %v1488_v48  ;;  %v3898_v52 = vadd.f32 %v1494_v5, %v1475_v31  ;;  %v3900_v59 = vadd.f32 %v1494_v5, %v1476_v44  ;;  %v3902_v11 = vadd.f32 %v1494_v5, %v1477_v62  ;;  %v3165_v48 = vld [vmem:[#allocation2 + $0x18] sm:$0xff]   ;;  %v3166_v31 = vld [vmem:[#allocation2 + $0x20] sm:$0xff]   ;;  %v3130_v44 = vld [vmem:[#allocation7 + $0x130] sm:$0xff]  }
 0x65f   :  { %v3904_v21 = vadd.f32 %v1494_v5, %v1478_v43  ;;  %v3906_v1 = vadd.f32 %v1494_v5, %v1479_v50  ;;  %v3908_v0 = vadd.f32 %v1494_v5, %v1480_v2  ;;  %v3910_v15 = vadd.f32 %v1494_v5, %v1481_v53  ;;  %v3167_v50 = vld [vmem:[#allocation2 + $0x28] sm:$0xff]   ;;  %v3168_v2 = vld [vmem:[#allocation2 + $0x30] sm:$0xff]   ;;  %2970 = vmatprep.subr.bf16.mxu1 %v3130_v44 }
 0x660   :  { %v1511_v32 = vmax.f32 %v3898_v52, 0.0  ;;  %v1512_v20 = vmax.f32 %v3900_v59, 0.0  ;;  %v1513_v60 = vmax.f32 %v3902_v11, 0.0  ;;  %v3916_v6 = vadd.f32 %v1494_v5, %v1482_v26  ;;  %2971 = vmatpush3.bf16.msra.mxu1 %v3130_v44  ;;  %v3131_v26 = vld [vmem:[#allocation7 + $0x138] sm:$0xff]  }
 0x661   :  { %v1514_v49 = vmax.f32 %v3904_v21, 0.0  ;;  %v3922_v42 = vadd.f32 %v1494_v5, %v1483_v47  ;;  %v3924_v27 = vadd.f32 %v1494_v5, %v1484_v57  ;;  %v1515_v56 = vmax.f32 %v3906_v1, 0.0  ;;  %2972 = vmatprep.subr.bf16.mxu1 %v3131_v26  ;;  %v3132_v47 = vld [vmem:[#allocation7 + $0x140] sm:$0xff]   ;;  %v3133_v57 = vld [vmem:[#allocation7 + $0x148] sm:$0xff]  }
 0x662   :  { %v1529_v45 = vpack.c.bf16 %v1512_v20, %v1511_v32  ;;  %v3927_v7 = vadd.f32 %v1494_v5, %v1485_v46  ;;  %v1516_v54 = vmax.f32 %v3908_v0, 0.0  ;;  %v3934_v58 = vadd.f32 %v1494_v5, %v1486_v10  ;;  %v3134_v46 = vld [vmem:[#allocation7 + $0x150] sm:$0xff]   ;;  %v3135_v10 = vld [vmem:[#allocation7 + $0x158] sm:$0xff]  }
 0x663   :  { %v1530_v22 = vpack.c.bf16 %v1514_v49, %v1513_v60  ;;  %v3936_v23 = vadd.f32 %v1494_v5, %v1487_v25  ;;  %v3938_v51 = vadd.f32 %v1494_v5, %v1489_v63  ;;  %v3940_v13 = vadd.f32 %v1494_v5, %v1490_v37  ;;  %v3136_v25 = vld [vmem:[#allocation7 + $0x160] sm:$0xff]   ;;  %v3137_v5 = vld [vmem:[#allocation7 + $0x168] sm:$0xff]  }
 0x664   :  { %2926 = vmatprep.subr.bf16.mxu0 %v1529_v45  ;;  %v1531_v8 = vpack.c.bf16 %v1516_v54, %v1515_v56  ;;  %v1517_v24 = vmax.f32 %v3910_v15, 0.0  ;;  %v1518_v30 = vmax.f32 %v3916_v6, 0.0  ;;  %v1519_v61 = vmax.f32 %v3922_v42, 0.0  ;;  %2973 = vmatpush3.bf16.msra.mxu1 %v3131_v26 }
 0x665   :  { %2927 = vmatpush3.bf16.msra.mxu0 %v1529_v45  ;;  %v1520_v28 = vmax.f32 %v3924_v27, 0.0  ;;  %v1521_v38 = vmax.f32 %v3927_v7, 0.0  ;;  %v1522_v3 = vmax.f32 %v3934_v58, 0.0  ;;  %v1524_v41 = vmax.f32 %v3896_v55, 0.0 }
 0x666   :  { %2928 = vmatprep.subr.bf16.mxu0 %v1530_v22  ;;  %v1532_v36 = vpack.c.bf16 %v1518_v30, %v1517_v24  ;;  %v1523_v17 = vmax.f32 %v3936_v23, 0.0  ;;  %v1525_v19 = vmax.f32 %v3938_v51, 0.0  ;;  %v1526_v40 = vmax.f32 %v3940_v13, 0.0  ;;  %v4008_v51 = vld [vmem:[#allocation8 + $0x10] sm:$0xff] }
 0x667   :  { %v1533_v12 = vpack.c.bf16 %v1520_v28, %v1519_v61  ;;  %v1534_v16 = vpack.c.bf16 %v1522_v3, %v1521_v38  ;;  %v1662_v13 = vrot.slane %v4008_v51, %v3582_v34 }
 0x668   :  { %v1535_v18 = vpack.c.bf16 %v1524_v41, %v1523_v17  ;;  %v1536_v33 = vpack.c.bf16 %v1526_v40, %v1525_v19 }
 0x669   :  { %2929 = vmatpush3.bf16.msra.mxu0 %v1530_v22 }
 0x66a   :  { %2930 = vmatprep.subr.bf16.mxu0 %v1531_v8 }
 0x66d   :  { %2931 = vmatpush3.bf16.msra.mxu0 %v1531_v8 }
 0x66e   :  { %2932 = vmatprep.subr.bf16.mxu0 %v1532_v36 }
 0x671   :  { %2933 = vmatpush3.bf16.msra.mxu0 %v1532_v36 }
 0x672   :  { %2934 = vmatprep.subr.bf16.mxu0 %v1533_v12 }
 0x675   :  { %2935 = vmatpush3.bf16.msra.mxu0 %v1533_v12 }
 0x676   :  { %2936 = vmatprep.subr.bf16.mxu0 %v1534_v16 }
 0x679   :  { %2937 = vmatpush3.bf16.msra.mxu0 %v1534_v16 }
 0x67a   :  { %2938 = vmatprep.subr.bf16.mxu0 %v1535_v18 }
 0x67d   :  { %2939 = vmatpush3.bf16.msra.mxu0 %v1535_v18 }
 0x67e   :  { %2940 = vmatprep.subr.bf16.mxu0 %v1536_v33 }
 0x681   :  { %2941 = vmatpush3.bf16.msra.mxu0 %v1536_v33 }
 0x682   :  { %2990 = vmatprep.subr.bf16.mxu0 %v3132_v47 }
 0x684   :  { %2943 = vmatmul.mubr.bf16.vlgmr.msra.gmra.mrb[48].mxu0 %v3163_v4 }
 0x685   :  { %2946 = vmatprep.mubr.bf16.mxu0 %v3164_v35  ;;  %2991 = vmatpush3.bf16.msra.mxu0 %v3132_v47 }
 0x686   :  { %2992 = vmatprep.subr.bf16.mxu0 %v3133_v57 }
 0x689   :  { %2993 = vmatpush3.bf16.msra.mxu0 %v3133_v57 }
 0x68a   :  { %2994 = vmatprep.subr.bf16.mxu0 %v3134_v46 }
 0x68c   :  { %2947 = vmatmul.mubr.bf16.gmra.mrb[52].mxu0 %v3165_v48 }
 0x68d   :  { %2950 = vmatprep.mubr.bf16.mxu0 %v3166_v31  ;;  %2995 = vmatpush3.bf16.msra.mxu0 %v3134_v46 }
 0x68e   :  { %2996 = vmatprep.subr.bf16.mxu0 %v3135_v10 }
 0x691   :  { %2997 = vmatpush3.bf16.msra.mxu0 %v3135_v10 }
 0x692   :  { %2998 = vmatprep.subr.bf16.mxu0 %v3136_v25 }
 0x694   :  { %2951 = vmatmul.mubr.bf16.gmra.mrb[56].mxu0 %v3167_v50  ;;  %v3139_v50 = vld [vmem:[#allocation7 + $0x178] sm:$0xff]  }
 0x695   :  { %2954 = vmatprep.mubr.bf16.mxu0 %v3168_v2  ;;  %2999 = vmatpush3.bf16.msra.mxu0 %v3136_v25 }
 0x696   :  { %3000 = vmatprep.subr.bf16.mxu0 %v3137_v5 }
 0x699   :  { %3001 = vmatpush3.bf16.msra.mxu0 %v3137_v5 }
 0x69c   :  { %2955 = vmatmul.mubr.bf16.gmra.mrb[60].mxu0 %v3169_v9 }
 0x757   :  { %v2944_v62 = vpop.f32.mrb[48].mxu0 }
 0x758   :  { %v1571_v63 = vpop.f32.mrb[49].mxu0  ;;  %v1580_v43 = vadd.f32 %v2944_v62, %v1513_v60 }
 0x759   :  { %v2945_v37 = vpop.f32.mrb[50].mxu0  ;;  %v1572_v22 = vadd.f32 %v1571_v63, %v1511_v32 }
 0x75a   :  { %v1583_v53 = vadd.f32 %v2945_v37, %v1514_v49  ;;  %v1574_v45 = vpop.f32.mrb[51].mxu0 }
 0x75b   :  { %v1575_v8 = vadd.f32 %v1574_v45, %v1512_v20 }
 0x75c   :  { %v1635_v36 = vpack.c.bf16 %v1583_v53, %v1580_v43 }
 0x75d   :  { %v1634_v12 = vpack.c.bf16 %v1575_v8, %v1572_v22 }
 0x75f   :  { %v2948_v16 = vpop.f32.mrb[52].mxu0  ;;  %2974 = vmatprep.mubr.bf16.mxu1 %v1634_v12 }
 0x760   :  { %v1587_v18 = vpop.f32.mrb[53].mxu0  ;;  %2975 = vmatmul.mubr.bf16.vlgmr.msra.gmra.mrb[48].mxu1 %v1635_v36  ;;  %v1596_v11 = vadd.f32 %v2948_v16, %v1517_v24 }
 0x761   :  { %v2949_v33 = vpop.f32.mrb[54].mxu0  ;;  %v1588_v52 = vadd.f32 %v1587_v18, %v1515_v56 }
 0x762   :  { %v1599_v21 = vadd.f32 %v2949_v33, %v1518_v30  ;;  %v1590_v60 = vpop.f32.mrb[55].mxu0 }
 0x763   :  { %v1591_v59 = vadd.f32 %v1590_v60, %v1516_v54 }
 0x764   :  { %v1637_v32 = vpack.c.bf16 %v1599_v21, %v1596_v11 }
 0x765   :  { %v1636_v20 = vpack.c.bf16 %v1591_v59, %v1588_v52 }
 0x767   :  { %v2952_v49 = vpop.f32.mrb[56].mxu0  ;;  %2978 = vmatprep.mubr.bf16.mxu1 %v1636_v20 }
 0x768   :  { %v1603_v4 = vpop.f32.mrb[57].mxu0  ;;  %2979 = vmatmul.mubr.bf16.gmra.mrb[52].mxu1 %v1637_v32  ;;  %v1612_v15 = vadd.f32 %v2952_v49, %v1521_v38 }
 0x769   :  { %v2953_v35 = vpop.f32.mrb[58].mxu0  ;;  %v1604_v1 = vadd.f32 %v1603_v4, %v1519_v61 }
 0x76a   :  { %v1615_v6 = vadd.f32 %v2953_v35, %v1522_v3  ;;  %v1606_v24 = vpop.f32.mrb[59].mxu0  ;;  %v3138_v3 = vld [vmem:[#allocation7 + $0x170] sm:$0xff]  }
 0x76b   :  { %v1607_v0 = vadd.f32 %v1606_v24, %v1520_v28  ;;  %3002 = vmatprep.subr.bf16.mxu0 %v3138_v3 }
 0x76c   :  { %v1639_v56 = vpack.c.bf16 %v1615_v6, %v1612_v15  ;;  %3003 = vmatpush3.bf16.msra.mxu0 %v3138_v3  ;;  %v3140_v3 = vld [vmem:[#allocation10] sm:$0xff]  }
 0x76d   :  { %v1638_v54 = vpack.c.bf16 %v1607_v0, %v1604_v1  ;;  %3004 = vmatprep.subr.bf16.mxu0 %v3139_v50 }
 0x76f   :  { %v2956_v30 = vpop.f32.mrb[60].mxu0  ;;  %2982 = vmatprep.mubr.bf16.mxu1 %v1638_v54 }
 0x770   :  { %v1619_v48 = vpop.f32.mrb[61].mxu0  ;;  %2983 = vmatmul.mubr.bf16.gmra.mrb[56].mxu1 %v1639_v56  ;;  %v1628_v7 = vadd.f32 %v2956_v30, %v1525_v19  ;;  %3005 = vmatpush3.bf16.msra.mxu0 %v3139_v50  ;;  %v3141_v50 = vld [vmem:[#allocation10 + $0x8] sm:$0xff]  }
 0x771   :  { %v2957_v31 = vpop.f32.mrb[62].mxu0  ;;  %v1620_v42 = vadd.f32 %v1619_v48, %v1523_v17 }
 0x772   :  { %v1631_v58 = vadd.f32 %v2957_v31, %v1526_v40  ;;  %v1622_v38 = vpop.f32.mrb[63].mxu0 }
 0x773   :  { %v1623_v27 = vadd.f32 %v1622_v38, %v1524_v41 }
 0x774   :  { %v1641_v61 = vpack.c.bf16 %v1631_v58, %v1628_v7 }
 0x775   :  { %v1640_v28 = vpack.c.bf16 %v1623_v27, %v1620_v42 }
 0x777   :  { %2986 = vmatprep.mubr.bf16.mxu1 %v1640_v28  ;;  %v3365_v28 = vmov 0.0  }
 0x778   :  { %2987 = vmatmul.mubr.bf16.gmra.mrb[60].mxu1 %v1641_v61  ;;  %3022 = vmatprep.subr.bf16.mxu1 %v3365_v28 }
 0x779   :  { %3042 = vmatprep.subr.bf16.mxu0 %v3365_v28  ;;  %3038 = vmatprep.mubr.msk.bf16.mxu1 %vm3366_vm0, %v3365_v28 }
 0x833   :  { %v2976_v23 = vpop.f32.mrb[48].mxu1 }
 0x834   :  { %v1754_v17 = vadd.f32 %v2976_v23, %v1662_v13  ;;  %v1745_v19 = vpop.f32.mrb[49].mxu1  ;;  %v4019_v23 = vrot.slane %v4008_v51, %v3589_v39 }
 0x835   :  { %v1746_v55 = vadd.f32 %v1745_v19, %v1662_v13  ;;  %v2977_v41 = vpop.f32.mrb[50].mxu1  ;;  %v3143_v19 = vld [vmem:[#allocation10 + $0x18] sm:$0xff]  }
 0x836   :  { %v1757_v40 = vadd.f32 %v2977_v41, %v1662_v13  ;;  %v1748_v2 = vpop.f32.mrb[51].mxu1  ;;  %v1810_v44 = vmax.f32 %v1754_v17, 0.0 }
 0x837   :  { %v1749_v9 = vadd.f32 %v1748_v2, %v1662_v13  ;;  %v1808_v47 = vmax.f32 %v1746_v55, 0.0 }
 0x838   :  { %v1811_v26 = vmax.f32 %v1757_v40, 0.0 }
 0x839   :  { %v1809_v57 = vmax.f32 %v1749_v9, 0.0 }
 0x83a   :  { %v1825_v46 = vpack.c.bf16 %v1811_v26, %v1810_v44 }
 0x83b   :  { %v1824_v10 = vpack.c.bf16 %v1809_v57, %v1808_v47  ;;  %v2980_v25 = vpop.f32.mrb[52].mxu1  ;;  %v3144_v47 = vld [vmem:[#allocation10 + $0x20] sm:$0xff]  }
 0x83c   :  { %v1770_v5 = vadd.f32 %v2980_v25, %v1662_v13  ;;  %v1761_v62 = vpop.f32.mrb[53].mxu1 }
 0x83d   :  { %v1762_v63 = vadd.f32 %v1761_v62, %v1662_v13  ;;  %v2981_v37 = vpop.f32.mrb[54].mxu1  ;;  %3006 = vmatprep.mubr.bf16.mxu0 %v1824_v10 }
 0x83e   :  { %v1773_v34 = vadd.f32 %v2981_v37, %v1662_v13  ;;  %v1764_v43 = vpop.f32.mrb[55].mxu1  ;;  %3007 = vmatmul.mubr.bf16.vlgmr.msra.gmra.mrb[64].mxu0 %v1825_v46  ;;  %v1814_v45 = vmax.f32 %v1770_v5, 0.0 }
 0x83f   :  { %v1765_v53 = vadd.f32 %v1764_v43, %v1662_v13  ;;  %v1812_v8 = vmax.f32 %v1762_v63, 0.0  ;;  %3043 = vmatpush3.bf16.msra.mxu0 %v3140_v3 }
 0x840   :  { %v1815_v22 = vmax.f32 %v1773_v34, 0.0  ;;  %3044 = vmatprep.subr.bf16.mxu0 %v3365_v28  ;;  %v3145_v34 = vld [vmem:[#allocation10 + $0x28] sm:$0xff]  }
 0x841   :  { %v1813_v36 = vmax.f32 %v1765_v53, 0.0 }
 0x842   :  { %v1827_v12 = vpack.c.bf16 %v1815_v22, %v1814_v45 }
 0x843   :  { %v1826_v16 = vpack.c.bf16 %v1813_v36, %v1812_v8  ;;  %v2984_v18 = vpop.f32.mrb[56].mxu1  ;;  %3045 = vmatpush3.bf16.msra.mxu0 %v3141_v50 }
 0x844   :  { %v1786_v33 = vadd.f32 %v2984_v18, %v1662_v13  ;;  %v1777_v11 = vpop.f32.mrb[57].mxu1  ;;  %3046 = vmatprep.subr.bf16.mxu0 %v3365_v28 }
 0x845   :  { %v1778_v21 = vadd.f32 %v1777_v11, %v1662_v13  ;;  %v2985_v60 = vpop.f32.mrb[58].mxu1  ;;  %3010 = vmatprep.mubr.bf16.mxu0 %v1826_v16 }
 0x846   :  { %v1789_v52 = vadd.f32 %v2985_v60, %v1662_v13  ;;  %v1780_v59 = vpop.f32.mrb[59].mxu1  ;;  %3011 = vmatmul.mubr.bf16.gmra.mrb[68].mxu0 %v1827_v12  ;;  %v1818_v20 = vmax.f32 %v1786_v33, 0.0 }
 0x847   :  { %v1781_v32 = vadd.f32 %v1780_v59, %v1662_v13  ;;  %v1816_v4 = vmax.f32 %v1778_v21, 0.0  ;;  %v3146_v21 = vld [vmem:[#allocation10 + $0x30] sm:$0xff]  }
 0x848   :  { %v1819_v49 = vmax.f32 %v1789_v52, 0.0 }
 0x849   :  { %v1817_v35 = vmax.f32 %v1781_v32, 0.0 }
 0x84a   :  { %v1829_v15 = vpack.c.bf16 %v1819_v49, %v1818_v20 }
 0x84b   :  { %v1828_v6 = vpack.c.bf16 %v1817_v35, %v1816_v4  ;;  %v2988_v24 = vpop.f32.mrb[60].mxu1 }
 0x84c   :  { %v1802_v1 = vadd.f32 %v2988_v24, %v1662_v13  ;;  %v1793_v0 = vpop.f32.mrb[61].mxu1 }
 0x84d   :  { %v1794_v56 = vadd.f32 %v1793_v0, %v1662_v13  ;;  %v2989_v54 = vpop.f32.mrb[62].mxu1  ;;  %3014 = vmatprep.mubr.bf16.mxu0 %v1828_v6 }
 0x84e   :  { %v1805_v30 = vadd.f32 %v2989_v54, %v1662_v13  ;;  %v1796_v48 = vpop.f32.mrb[63].mxu1  ;;  %3015 = vmatmul.mubr.bf16.gmra.mrb[72].mxu0 %v1829_v15  ;;  %v1822_v7 = vmax.f32 %v1802_v1, 0.0 }
 0x84f   :  { %v1797_v31 = vadd.f32 %v1796_v48, %v1662_v13  ;;  %v1820_v38 = vmax.f32 %v1794_v56, 0.0  ;;  %v3142_v13 = vld [vmem:[#allocation10 + $0x10] sm:$0xff]  }
 0x850   :  { %v1823_v58 = vmax.f32 %v1805_v30, 0.0  ;;  %3047 = vmatpush3.bf16.msra.mxu0 %v3142_v13 }
 0x851   :  { %v1821_v42 = vmax.f32 %v1797_v31, 0.0  ;;  %3048 = vmatprep.subr.bf16.mxu0 %v3365_v28 }
 0x852   :  { %v1831_v27 = vpack.c.bf16 %v1823_v58, %v1822_v7 }
 0x853   :  { %v1830_v61 = vpack.c.bf16 %v1821_v42, %v1820_v38 }
 0x854   :  { %3049 = vmatpush3.bf16.msra.mxu0 %v3143_v19 }
 0x855   :  { %3018 = vmatprep.mubr.bf16.mxu0 %v1830_v61  ;;  %3050 = vmatprep.subr.bf16.mxu0 %v3365_v28 }
 0x856   :  { %3019 = vmatmul.mubr.bf16.gmra.mrb[76].mxu0 %v1831_v27 }
 0x857   :  { %3058 = vmatprep.mubr.msk.bf16.mxu0 %vm3366_vm0, %v3365_v28 }
 0x858   :  { %3051 = vmatpush3.bf16.msra.mxu0 %v3144_v47 }
 0x859   :  { %3052 = vmatprep.subr.bf16.mxu0 %v3365_v28 }
 0x85c   :  { %3053 = vmatpush3.bf16.msra.mxu0 %v3145_v34 }
 0x85d   :  { %3054 = vmatprep.subr.bf16.mxu0 %v3365_v28 }
 0x860   :  { %3055 = vmatpush3.bf16.msra.mxu0 %v3146_v21 }
 0x861   :  { %3056 = vmatprep.subr.bf16.mxu0 %v3365_v28 }
 0x911   :  { %v3008_v17 = vpop.f32.mrb[64].mxu0 }
 0x912   :  { %v4023_v55 = vadd.f32 %v3008_v17, %v4019_v23  ;;  %v1935_v41 = vpop.f32.mrb[65].mxu0 }
 0x913   :  { %v4027_v40 = vadd.f32 %v1935_v41, %v4019_v23  ;;  %v3009_v2 = vpop.f32.mrb[66].mxu0 }
 0x914   :  { %v1938_v9 = vpop.f32.mrb[67].mxu0  ;;  %v2000_v44 = vmul.f32 0.0, %v4023_v55  ;;  %v4031_v39 = vadd.f32 %v3009_v2, %v4019_v23 }
 0x915   :  { %v4034_v26 = vadd.f32 %v1938_v9, %v4019_v23  ;;  %v2036_v57 = vmul.f32 %v4027_v40, %v4027_v40 }
 0x916   :  { %v2038_v25 = vmul.f32 %v2000_v44, %v2000_v44  ;;  %v2001_v5 = vmul.f32 0.0, %v4031_v39 }
 0x917   :  { %v2014_v46 = vadd.f32 %v4034_v26, %v4027_v40  ;;  %v2037_v10 = vmul.f32 %v4034_v26, %v4034_v26 }
 0x918   :  { %v2039_v16 = vmul.f32 %v2001_v5, %v2001_v5 }
 0x919   :  { %v2015_v62 = vadd.f32 %v2014_v46, %v2000_v44  ;;  %v2052_v63 = vadd.f32 %v2037_v10, %v2036_v57  ;;  %v3012_v37 = vpop.f32.mrb[68].mxu0 }
 0x91a   :  { %v4045_v43 = vadd.f32 %v3012_v37, %v4019_v23  ;;  %v1951_v53 = vpop.f32.mrb[69].mxu0 }
 0x91b   :  { %v2053_v45 = vadd.f32 %v2052_v63, %v2038_v25  ;;  %v4049_v22 = vadd.f32 %v1951_v53, %v4019_v23  ;;  %v3013_v8 = vpop.f32.mrb[70].mxu0  ;;  %v2016_v33 = vadd.f32 %v2015_v62, %v2001_v5 }
 0x91c   :  { %v4052_v36 = vadd.f32 %v3013_v8, %v4019_v23  ;;  %v1954_v12 = vpop.f32.mrb[71].mxu0  ;;  %v2004_v60 = vmul.f32 0.0, %v4045_v43 }
 0x91d   :  { %v2002_v18 = vmul.f32 0.0, %v4049_v22  ;;  %v4056_v11 = vadd.f32 %v1954_v12, %v4019_v23  ;;  %v2054_v32 = vadd.f32 %v2053_v45, %v2039_v16 }
 0x91e   :  { %v2005_v49 = vmul.f32 0.0, %v4052_v36  ;;  %v2042_v0 = vmul.f32 %v2004_v60, %v2004_v60 }
 0x91f   :  { %v2017_v52 = vadd.f32 %v2016_v33, %v2002_v18  ;;  %v2040_v59 = vmul.f32 %v2002_v18, %v2002_v18  ;;  %v2003_v20 = vmul.f32 0.0, %v4056_v11 }
 0x920   :  { %v2043_v31 = vmul.f32 %v2005_v49, %v2005_v49 }
 0x921   :  { %v2055_v4 = vadd.f32 %v2054_v32, %v2040_v59  ;;  %v2018_v35 = vadd.f32 %v2017_v52, %v2003_v20  ;;  %v2041_v15 = vmul.f32 %v2003_v20, %v2003_v20  ;;  %v3016_v6 = vpop.f32.mrb[72].mxu0 }
 0x922   :  { %v4063_v24 = vadd.f32 %v3016_v6, %v4019_v23  ;;  %v1967_v1 = vpop.f32.mrb[73].mxu0 }
 0x923   :  { %v2019_v56 = vadd.f32 %v2018_v35, %v2004_v60  ;;  %v2056_v54 = vadd.f32 %v2055_v4, %v2041_v15  ;;  %v4067_v30 = vadd.f32 %v1967_v1, %v4019_v23  ;;  %v3017_v48 = vpop.f32.mrb[74].mxu0 }
 0x924   :  { %v4070_v7 = vadd.f32 %v3017_v48, %v4019_v23  ;;  %v1970_v58 = vpop.f32.mrb[75].mxu0  ;;  %v2008_v3 = vmul.f32 0.0, %v4063_v24 }
 0x925   :  { %v2057_v38 = vadd.f32 %v2056_v54, %v2042_v0  ;;  %v2006_v42 = vmul.f32 0.0, %v4067_v30  ;;  %v2020_v27 = vadd.f32 %v2019_v56, %v2005_v49  ;;  %v4074_v61 = vadd.f32 %v1970_v58, %v4019_v23 }
 0x926   :  { %v2009_v41 = vmul.f32 0.0, %v4070_v7  ;;  %v2046_v10 = vmul.f32 %v2008_v3, %v2008_v3 }
 0x927   :  { %v2021_v50 = vadd.f32 %v2020_v27, %v2006_v42  ;;  %v2044_v13 = vmul.f32 %v2006_v42, %v2006_v42  ;;  %v2058_v17 = vadd.f32 %v2057_v38, %v2043_v31  ;;  %v2007_v19 = vmul.f32 0.0, %v4074_v61 }
 0x928   :  { %v2047_v37 = vmul.f32 %v2009_v41, %v2009_v41 }
 0x929   :  { %v2059_v2 = vadd.f32 %v2058_v17, %v2044_v13  ;;  %v2022_v9 = vadd.f32 %v2021_v50, %v2007_v19  ;;  %v2045_v44 = vmul.f32 %v2007_v19, %v2007_v19  ;;  %v3020_v47 = vpop.f32.mrb[76].mxu0 }
 0x92a   :  { %v4080_v57 = vadd.f32 %v3020_v47, %v4019_v23  ;;  %v1983_v46 = vpop.f32.mrb[77].mxu0 }
 0x92b   :  { %v2023_v25 = vadd.f32 %v2022_v9, %v2008_v3  ;;  %v2060_v5 = vadd.f32 %v2059_v2, %v2045_v44  ;;  %v1984_v62 = vadd.f32 %v1983_v46, %v4019_v23  ;;  %v3021_v63 = vpop.f32.mrb[78].mxu0 }
 0x92c   :  { %v1995_v34 = vadd.f32 %v3021_v63, %v4019_v23  ;;  %v1986_v53 = vpop.f32.mrb[79].mxu0  ;;  %v2012_v18 = vmul.f32 0.0, %v4080_v57 }
 0x92d   :  { %v2061_v45 = vadd.f32 %v2060_v5, %v2046_v10  ;;  %v2010_v8 = vmul.f32 0.0, %v1984_v62  ;;  %v2024_v12 = vadd.f32 %v2023_v25, %v2009_v41  ;;  %v1987_v16 = vadd.f32 %v1986_v53, %v4019_v23 }
 0x92e   :  { %v2013_v32 = vmul.f32 0.0, %v1995_v34  ;;  %v2050_v4 = vmul.f32 %v2012_v18, %v2012_v18 }
 0x92f   :  { %v2025_v33 = vadd.f32 %v2024_v12, %v2010_v8  ;;  %v2048_v21 = vmul.f32 %v2010_v8, %v2010_v8  ;;  %v2062_v60 = vadd.f32 %v2061_v45, %v2047_v37  ;;  %v2011_v52 = vmul.f32 0.0, %v1987_v16 }
 0x930   :  { %v2051_v6 = vmul.f32 %v2013_v32, %v2013_v32 }
 0x931   :  { %v2063_v59 = vadd.f32 %v2062_v60, %v2048_v21  ;;  %v2026_v20 = vadd.f32 %v2025_v33, %v2011_v52  ;;  %v2049_v49 = vmul.f32 %v2011_v52, %v2011_v52 }
 0x933   :  { %v2027_v35 = vadd.f32 %v2026_v20, %v2012_v18  ;;  %v2064_v15 = vadd.f32 %v2063_v59, %v2049_v49 }
 0x935   :  { %v2028_v1 = vadd.f32 %v2027_v35, %v2013_v32  ;;  %v2065_v0 = vadd.f32 %v2064_v15, %v2050_v4 }
 0x937   :  { %v2029_v56 = vrot.slane %v2028_v1, 4  ;;  %v2066_v54 = vadd.f32 %v2065_v0, %v2051_v6 }
 0x939   :  { %v2030_v48 = vadd.f32 %v2029_v56, %v2028_v1  ;;  %v2067_v23 = vrot.slane %v2066_v54, 4 }
 0x93b   :  { %v2031_v31 = vrot.slane %v2030_v48, 2  ;;  %v2068_v58 = vadd.f32 %v2067_v23, %v2066_v54 }
 0x93d   :  { %v2032_v38 = vadd.f32 %v2031_v31, %v2030_v48  ;;  %v2069_v42 = vrot.slane %v2068_v58, 2 }
 0x93f   :  { %v2033_v27 = vrot.slane %v2032_v38, 1  ;;  %v2070_v3 = vadd.f32 %v2069_v42, %v2068_v58 }
 0x941   :  { %v2034_v50 = vadd.f32 %v2033_v27, %v2032_v38  ;;  %v2071_v13 = vrot.slane %v2070_v3, 1 }
 0x943   :  { %v2035_v17 = vmul.f32 0.0625, %v2034_v50  ;;  %v2072_v19 = vadd.f32 %v2071_v13, %v2070_v3 }
 0x945   :  { %v2073_v41 = vmul.f32 0.0625, %v2072_v19  ;;  %v2074_v2 = vmul.f32 %v2035_v17, %v2035_v17 }
 0x947   :  { %v2075_v9 = vsub.f32 %v2073_v41, %v2074_v2 }
 0x949   :  { %v2076_v44 = vmax.f32 %v2075_v9, 0.0 }
 0x94b   :  { %v2077_v47 = vadd.f32 1e-05, %v2076_v44 }
 0x94d   :  { %3160 = vrsqrt.f32 %v2077_v47 }
 0x957   :  { %v3161_v46 = vpop.eup %3160 }
 0x958   :  { %v2079_v10 = vmul.f32 %v3161_v46, %v4008_v51  ;;  %v2221_v46 = vld [vmem:[%s4161_s6] sm:$0xf] }
 0x95a   :  { %v2080_v25 = vmul.f32 %v2079_v10, %v2035_v17  ;;  %v2088_v5 = vrot.slane %v2079_v10, %v3661_v14  ;;  %v3147_v10 = vld [vmem:[#allocation10 + $0x38] sm:$0xff]  }
 0x95b   :  { %3057 = vmatpush3.bf16.msra.mxu0 %v3147_v10 }
 0x95c   :  { %v2082_v63 = vrot.slane %v2080_v25, 7  ;;  %v2101_v37 = vmul.f32 %v2088_v5, %v1984_v62  ;;  %v2102_v53 = vmul.f32 %v2088_v5, %v1987_v16  ;;  %v2093_v45 = vmul.f32 %v2088_v5, %v4049_v22 }
 0x95d   :  { %v2089_v12 = vmul.f32 %v2088_v5, %v4027_v40  ;;  %v2094_v18 = vmul.f32 %v2088_v5, %v4056_v11  ;;  %v2096_v33 = vmul.f32 %v2088_v5, %v4052_v36  ;;  %v2097_v21 = vmul.f32 %v2088_v5, %v4067_v30 }
 0x95e   :  { %v2084_v8 = vsub.f32 %v4008_v51, %v2082_v63  ;;  %v2098_v60 = vmul.f32 %v2088_v5, %v4074_v61  ;;  %v2099_v52 = vmul.f32 %v2088_v5, %v4063_v24  ;;  %v2100_v14 = vmul.f32 %v2088_v5, %v4070_v7 }
 0x95f   :  { %v2090_v22 = vmul.f32 %v2088_v5, %v4034_v26  ;;  %v2103_v51 = vmul.f32 %v2088_v5, %v4080_v57  ;;  %v2104_v16 = vmul.f32 %v2088_v5, %v1995_v34  ;;  %v2091_v40 = vmul.f32 %v2088_v5, %v4023_v55 }
 0x960   :  { %v2108_v62 = vrot.slane %v2084_v8, %v3666_v29  ;;  %v2092_v11 = vmul.f32 %v2088_v5, %v4031_v39  ;;  %v2095_v36 = vmul.f32 %v2088_v5, %v4045_v43 }
 0x962   :  { %v2121_v30 = vadd.f32 %v2108_v62, %v2101_v37  ;;  %v2122_v59 = vadd.f32 %v2108_v62, %v2102_v53  ;;  %v2109_v61 = vadd.f32 %v2108_v62, %v2089_v12  ;;  %v2110_v32 = vadd.f32 %v2108_v62, %v2090_v22 }
 0x963   :  { %v2111_v24 = vadd.f32 %v2108_v62, %v2091_v40  ;;  %v2112_v20 = vadd.f32 %v2108_v62, %v2092_v11  ;;  %v2113_v7 = vadd.f32 %v2108_v62, %v2093_v45  ;;  %v2114_v49 = vadd.f32 %v2108_v62, %v2094_v18 }
 0x964   :  { %v2137_v29 = vmax.f32 %v2121_v30, 0.0  ;;  %v2138_v4 = vmax.f32 %v2122_v59, 0.0  ;;  %v2125_v26 = vmax.f32 %v2109_v61, 0.0  ;;  %v2126_v35 = vmax.f32 %v2110_v32, 0.0 }
 0x965   :  { %v2127_v57 = vmax.f32 %v2111_v24, 0.0  ;;  %v2128_v34 = vmax.f32 %v2112_v20, 0.0  ;;  %v2129_v15 = vmax.f32 %v2113_v7, 0.0  ;;  %v2130_v55 = vmax.f32 %v2114_v49, 0.0 }
 0x966   :  { %v2147_v6 = vpack.c.bf16 %v2138_v4, %v2137_v29  ;;  %v2141_v39 = vpack.c.bf16 %v2126_v35, %v2125_v26  ;;  %v2115_v1 = vadd.f32 %v2108_v62, %v2095_v36  ;;  %v2116_v43 = vadd.f32 %v2108_v62, %v2096_v33 }
 0x967   :  { %v2142_v0 = vpack.c.bf16 %v2128_v34, %v2127_v57  ;;  %v2143_v56 = vpack.c.bf16 %v2130_v55, %v2129_v15  ;;  %v2117_v54 = vadd.f32 %v2108_v62, %v2097_v21  ;;  %v2118_v48 = vadd.f32 %v2108_v62, %v2098_v60 }
 0x968   :  { %2570 = vst [vmem:[#allocation12 + $0x30] sm:$0xff] %v2147_v6   ;;  %2529 = vst [vmem:[#allocation12] sm:$0xff] %v2141_v39   ;;  %3023 = vmatpush3.bf16.msra.mxu1 %v2141_v39  ;;  %v2131_v23 = vmax.f32 %v2115_v1, 0.0  ;;  %v2132_v31 = vmax.f32 %v2116_v43, 0.0  ;;  %v2119_v58 = vadd.f32 %v2108_v62, %v2099_v52  ;;  %v2120_v38 = vadd.f32 %v2108_v62, %v2100_v14 }
 0x969   :  { %3024 = vmatprep.subr.bf16.mxu1 %v3365_v28  ;;  %2565 = vst [vmem:[#allocation12 + $0x8] sm:$0xff] %v2142_v0   ;;  %2566 = vst [vmem:[#allocation12 + $0x10] sm:$0xff] %v2143_v56   ;;  %v2133_v42 = vmax.f32 %v2117_v54, 0.0  ;;  %v2134_v27 = vmax.f32 %v2118_v48, 0.0  ;;  %v2123_v3 = vadd.f32 %v2108_v62, %v2103_v51  ;;  %v2124_v50 = vadd.f32 %v2108_v62, %v2104_v16 }
 0x96a   :  { %v2144_v13 = vpack.c.bf16 %v2132_v31, %v2131_v23  ;;  %v2135_v17 = vmax.f32 %v2119_v58, 0.0  ;;  %v2136_v19 = vmax.f32 %v2120_v38, 0.0 }
 0x96b   :  { %v2145_v41 = vpack.c.bf16 %v2134_v27, %v2133_v42  ;;  %v2139_v2 = vmax.f32 %v2123_v3, 0.0  ;;  %v2140_v9 = vmax.f32 %v2124_v50, 0.0 }
 0x96c   :  { %3025 = vmatpush3.bf16.msra.mxu1 %v2142_v0  ;;  %2567 = vst [vmem:[#allocation12 + $0x18] sm:$0xff] %v2144_v13   ;;  %v2146_v44 = vpack.c.bf16 %v2136_v19, %v2135_v17 }
 0x96d   :  { %3026 = vmatprep.subr.bf16.mxu1 %v3365_v28  ;;  %2568 = vst [vmem:[#allocation12 + $0x20] sm:$0xff] %v2145_v41   ;;  %v2148_v47 = vpack.c.bf16 %v2140_v9, %v2139_v2 }
 0x96e   :  { %2569 = vst [vmem:[#allocation12 + $0x28] sm:$0xff] %v2146_v44  }
 0x96f   :  { %2571 = vst [vmem:[#allocation12 + $0x38] sm:$0xff] %v2148_v47  }
 0x970   :  { %3027 = vmatpush3.bf16.msra.mxu1 %v2143_v56 }
 0x971   :  { %3028 = vmatprep.subr.bf16.mxu1 %v3365_v28 }
 0x974   :  { %3029 = vmatpush3.bf16.msra.mxu1 %v2144_v13 }
 0x975   :  { %3030 = vmatprep.subr.bf16.mxu1 %v3365_v28 }
 0x978   :  { %3031 = vmatpush3.bf16.msra.mxu1 %v2145_v41 }
 0x979   :  { %3032 = vmatprep.subr.bf16.mxu1 %v3365_v28 }
 0x97c   :  { %3033 = vmatpush3.bf16.msra.mxu1 %v2146_v44 }
 0x97d   :  { %3034 = vmatprep.subr.bf16.mxu1 %v3365_v28 }
 0x980   :  { %3035 = vmatpush3.bf16.msra.mxu1 %v2147_v6 }
 0x981   :  { %3036 = vmatprep.subr.bf16.mxu1 %v3365_v28 }
 0x984   :  { %3037 = vmatpush3.bf16.msra.mxu1 %v2148_v47 }
 0x987   :  { %3039 = vmatmul.mubr.bf16.vlgmr.msra.gmra.mrb[64].mxu1 %v2221_v46 }
 0xa5a   :  { %v2256_v25 = vpop.f32.mrb[64].mxu1 }
 0xa5b   :  { %2262 = vst [vmem:[#allocation14] sm:$0xff] %v2256_v25  ;;  %v2263_v5 = vpack.c.bf16 %v2256_v25, %v2256_v25  ;;  %v3040_v63 = vpop.f32.mrb[65].mxu1 }
 0xa5c   :  { %v2259_v37 = vpop.f32.mrb[66].mxu1 }
 0xa5d   :  { %v3041_v53 = vpop.f32.mrb[67].mxu1  ;;  %3059 = vmatmul.mubr.bf16.vlgmr.msra.gmra.mrb[80].mxu0 %v2263_v5 }
 0xa5e   :  { %3291 = shalt.err (!%p3288_p2)
}
 0xa5f   :  { %s3292_s10 = scalar_lea.hbm %s4163_s8, 1024 }
 0xa60   :  { %p3293_p3 = scmp.ne.s32.totalorder %s4163_s8, %s3292_s10  ;;  %p3296_p4 = scmp.lt.u32.totalorder %s3292_s10, %s4163_s8 }
 0xa62   :  { %p3298_p5 = pnand %p3296_p4, %p3293_p3 }
 0xa64   :  { %3301 = shalt.err (!%p3298_p5)
}
 0xa65   :  { %2395 = dma.vmem_to_hbm [thread:$0]  %s2390_s11, 1024, %s4163_s8, [#allocation13], %s3358_s21, %s3358_s21, %s3359_s22  }
 0xa66   :  { %s3368_s20 = smov [#allocation14]  }
 0xa67   :  { %s2402_s23 = sshll.u32 %s3368_s20, 4  ;;  %s2403_s23 = int_to_ptr.vmem [resolvable:$true] %s2402_s23 }
 0xa68   :  { %s3302_s24 = scalar_lea.vmem %s2403_s23, 128  ;;  %p3307_p7 = scmp.lt.s32.totalorder %s2403_s23, %s2403_s23 }
 0xa69   :  { %p3303_p6 = scmp.ne.s32.totalorder %s2403_s23, %s3302_s24  ;;  %p3308_p8 = scmp.lt.s32.totalorder %s3302_s24, %s3302_s24 }
 0xa6b   :  { %p3309_p9 = por %p3308_p8, %p3307_p7 }
 0xa6d   :  { %p3310_p10 = pnand %p3309_p9, %p3303_p6 }
 0xa6f   :  { %3313 = shalt.err (!%p3310_p10)
}
 0xa70   :  { %s3314_s27 = scalar_lea.hbm %s4164_s9, 128 }
 0xa71   :  { %p3315_p11 = scmp.ne.s32.totalorder %s4164_s9, %s3314_s27  ;;  %p3318_p12 = scmp.lt.u32.totalorder %s3314_s27, %s4164_s9 }
 0xa73   :  { %p3320_p13 = pnand %p3318_p12, %p3315_p11 }
 0xa75   :  { %3323 = shalt.err (!%p3320_p13)
}
 0xa76   :  { %2405 = dma.vmem_to_hbm [thread:$0]  %s2403_s23, 128, %s4164_s9, [#allocation13]   ;;  %v2500_v28 = vld [vmem:[%s4160_s5] ss:$0 sm:$0xff] }
 0xa77   :  { %s3369_s4 = smov [#allocation11]  }
 0xa78   :  { %s2380_s29 = sshll.u32 %s3369_s4, 4  ;;  %s2381_s29 = int_to_ptr.vmem [resolvable:$true] %s2380_s29 }
 0xa79   :  { %s3324_s30 = scalar_lea.vmem %s2381_s29, 128  ;;  %p3329_p1 = scmp.lt.s32.totalorder %s2381_s29, %s2381_s29 }
 0xa7a   :  { %p3325_p0 = scmp.ne.s32.totalorder %s2381_s29, %s3324_s30  ;;  %p3330_p2 = scmp.lt.s32.totalorder %s3324_s30, %s3324_s30 }
 0xa7c   :  { %p3331_p3 = por %p3330_p2, %p3329_p1 }
 0xa7e   :  { %p3332_p4 = pnand %p3331_p3, %p3325_p0 }
 0xb30   :  { %v2367_v45 = vpop.f32.mrb[80].mxu0 }
 0xb31   :  { %v2368_v8 = vadd.f32 %v2500_v28, %v2367_v45  ;;  %v3060_v12 = vpop.f32.mrb[81].mxu0 }
 0xb32   :  { %v2370_v18 = vpop.f32.mrb[82].mxu0 }
 0xb33   :  { %2373 = vst [vmem:[#allocation11] sm:$0xff] %v2368_v8  ;;  %v3061_v33 = vpop.f32.mrb[83].mxu0 }
 0xb34   :  { %3335 = shalt.err (!%p3332_p4)
}
 0xb35   :  { %s3336_s5 = scalar_lea.hbm %s4162_s7, 128 }
 0xb36   :  { %p3337_p5 = scmp.ne.s32.totalorder %s4162_s7, %s3336_s5  ;;  %p3340_p6 = scmp.lt.u32.totalorder %s3336_s5, %s4162_s7 }
 0xb38   :  { %p3342_p7 = pnand %p3340_p6, %p3337_p5 }
 0xb3a   :  { %3345 = shalt.err (!%p3342_p7)
}
 0xb3b   :  { %2383 = dma.vmem_to_hbm [thread:$0]  %s2381_s29, 128, %s4162_s7, [#allocation4]  }
 0xb3c   :  { %3352 = dma.done.wait [#allocation4], 128  }
 0xb3d   :  { %3353 = vsyncadd [#allocation4], 4294967168 }
 0xb3e   :  { %3354 = dma.done.wait [#allocation13], 1152  }
 0xb3f   :  { %3355 = vsyncadd [#allocation13], 4294966144 }
 0xb40   :  { %2415 = vsyncpa [#allocation3], 1 }
 0xb41   :  { %2416 = vsyncpa [#allocation6], 1 }
 0xb42   :  { %2417 = vsyncpa [#allocation9], 1 }
 0xb43   :  { %2418 = vsyncpa [#allocation4], 1 }
 0xb44   :  { %2419 = vsyncpa [#allocation13], 1 }

</bundles_post_ra>
